<compile_context>
chip_gen: v6e
topology: v6e:2x2x1
jax: 0.10.0
libtpu: 0.0.40
codegen_flags: <defaults>
</compile_context>

<pallas_src>
import functools
import math

import jax
import jax.numpy as jnp
from jax.experimental import pallas as pl
from jax.experimental.pallas import tpu as pltpu


def _softmax_lastdim(s):
    # Lane-axis softmax; the divide goes to the EUP slot via approx reciprocal.
    m = jnp.max(s, axis=-1, keepdims=True)
    e = jnp.exp(s - m)
    return e * pl.reciprocal(jnp.sum(e, axis=-1, keepdims=True), approx=True)


def _bidir_cross_attn_kernel(x_ref, ctx_ref, wqk_ref, wv_ref, wcqk_ref,
                             wcv_ref, wout_ref, bout_ref, wcout_ref,
                             bcout_ref, out_ref, cout_ref,
                             *, heads, dim_head, batch_tile):
    f32 = jnp.float32
    bf16 = jnp.bfloat16

    # Weights arrive bf16 (softmax scale already folded into w_qk on the host).
    wqk, wv = wqk_ref[...], wv_ref[...]
    wcqk, wcv = wcqk_ref[...], wcv_ref[...]
    wout, wcout = wout_ref[...], wcout_ref[...]
    bout = bout_ref[...]        # (1, dim)   f32
    bcout = bcout_ref[...]      # (1, cdim)  f32

    contract_last = (((1,), (1,)), ((), ()))   # A @ B^T on the MXU

    for bb in range(batch_tile):               # static unroll over batch tile
        x = x_ref[bb]      # (i, dim)   bf16
        c = ctx_ref[bb]    # (j, cdim)  bf16

        # Input projections: bf16 x bf16 -> f32 accumulate, back to bf16 for
        # the attention matmuls.
        qk = jnp.dot(x, wqk, preferred_element_type=f32).astype(bf16)    # (i, inner)
        v = jnp.dot(x, wv, preferred_element_type=f32).astype(bf16)      # (i, inner)
        cqk = jnp.dot(c, wcqk, preferred_element_type=f32).astype(bf16)  # (j, inner)
        cv = jnp.dot(c, wcv, preferred_element_type=f32).astype(bf16)    # (j, inner)

        out_acc = None      # (i, dim)  f32
        cout_acc = None     # (j, cdim) f32
        for h in range(heads):                 # static unroll; heads is small
            sl = slice(h * dim_head, (h + 1) * dim_head)
            qk_h, cqk_h = qk[:, sl], cqk[:, sl]      # (i, d), (j, d)
            v_h, cv_h = v[:, sl], cv[:, sl]          # (i, d), (j, d)

            # Single sim matmul per head; the column softmax is derived from
            # one XLU transpose instead of a second MXU matmul.
            sim = jax.lax.dot_general(qk_h, cqk_h, contract_last,
                                      preferred_element_type=f32)         # (i, j)
            attn = _softmax_lastdim(sim)                      # softmax over j
            cattn_t = _softmax_lastdim(jnp.transpose(sim))    # (j, i), softmax over i

            head_out = jnp.dot(attn.astype(bf16), cv_h,
                               preferred_element_type=f32)     # (i, d)
            head_cout = jnp.dot(cattn_t.astype(bf16), v_h,
                                preferred_element_type=f32)    # (j, d)

            # Fused output projections: concat_h(head) @ W == sum_h head @ W[h-rows]
            o = jnp.dot(head_out.astype(bf16), wout[sl, :],
                        preferred_element_type=f32)            # (i, dim)
            co = jnp.dot(head_cout.astype(bf16), wcout[sl, :],
                         preferred_element_type=f32)           # (j, cdim)
            out_acc = o if out_acc is None else out_acc + o
            cout_acc = co if cout_acc is None else cout_acc + co

        out_ref[bb] = (out_acc + bout).astype(out_ref.dtype)
        cout_ref[bb] = (cout_acc + bcout).astype(cout_ref.dtype)


def bidirectional_cross_attention(x, context, params, *, heads, dim_head,
                                  batch_tile=1):
    b, seq_i, dim = x.shape
    b2, seq_j, cdim = context.shape
    assert b == b2
    assert b % batch_tile == 0, (b, batch_tile)
    inner = heads * dim_head
    scale = dim_head ** -0.5
    bf16 = jnp.bfloat16

    # bf16 at the kernel boundary (halves HBM->VMEM traffic, full bf16 MXU
    # rate); the softmax scale is folded into w_qk during the same cast.
    x_bf = x.astype(bf16)
    c_bf = context.astype(bf16)
    w_qk = (params['w_qk'] * scale).astype(bf16)
    w_v = params['w_v'].astype(bf16)
    w_cqk = params['w_cqk'].astype(bf16)
    w_cv = params['w_cv'].astype(bf16)
    w_out = params['w_out'].astype(bf16)
    w_cout = params['w_cout'].astype(bf16)
    b_out = params['b_out'].astype(jnp.float32)
    b_cout = params['b_cout'].astype(jnp.float32)

    kernel = functools.partial(_bidir_cross_attn_kernel, heads=heads,
                               dim_head=dim_head, batch_tile=batch_tile)

    full = lambda bi: (0, 0)   # weights/biases: same block for every grid step

    return pl.pallas_call(
        kernel,
        out_shape=(jax.ShapeDtypeStruct((b, seq_i, dim), jnp.float32),
                   jax.ShapeDtypeStruct((b, seq_j, cdim), jnp.float32)),
        grid=(b // batch_tile,),
        in_specs=[
            pl.BlockSpec((batch_tile, seq_i, dim), lambda bi: (bi, 0, 0)),   # x
            pl.BlockSpec((batch_tile, seq_j, cdim), lambda bi: (bi, 0, 0)),  # ctx
            pl.BlockSpec((dim, inner), full),     # w_qk (scale folded)
            pl.BlockSpec((dim, inner), full),     # w_v
            pl.BlockSpec((cdim, inner), full),    # w_cqk
            pl.BlockSpec((cdim, inner), full),    # w_cv
            pl.BlockSpec((inner, dim), full),     # w_out
            pl.BlockSpec((1, dim), full),         # b_out
            pl.BlockSpec((inner, cdim), full),    # w_cout
            pl.BlockSpec((1, cdim), full),        # b_cout
        ],
        out_specs=(
            pl.BlockSpec((batch_tile, seq_i, dim), lambda bi: (bi, 0, 0)),
            pl.BlockSpec((batch_tile, seq_j, cdim), lambda bi: (bi, 0, 0)),
        ),
        compiler_params=pltpu.CompilerParams(
            dimension_semantics=("parallel",)),
    )(x_bf, c_bf, w_qk, w_v, w_cqk, w_cv, w_out, b_out, w_cout, b_cout)


# ----------------------------- pure-JAX reference ----------------------------

def reference_forward(x, context, params, *, heads, dim_head):
    b, seq_i, _ = x.shape
    _, seq_j, _ = context.shape
    inner = heads * dim_head
    scale = dim_head ** -0.5

    qk = x @ params['w_qk']
    v = x @ params['w_v']
    cqk = context @ params['w_cqk']
    cv = context @ params['w_cv']

    def split(t):                      # (b, n, h*d) -> (b, h, n, d)
        return t.reshape(b, -1, heads, dim_head).transpose(0, 2, 1, 3)

    qk, cqk, v, cv = map(split, (qk, cqk, v, cv))
    sim = jnp.einsum('bhid,bhjd->bhij', qk, cqk) * scale
    attn = jax.nn.softmax(sim, axis=-1)
    cattn = jax.nn.softmax(sim, axis=-2)
    out = jnp.einsum('bhij,bhjd->bhid', attn, cv)
    cout = jnp.einsum('bhji,bhjd->bhid', cattn, v)
    out = out.transpose(0, 2, 1, 3).reshape(b, seq_i, inner)
    cout = cout.transpose(0, 2, 1, 3).reshape(b, seq_j, inner)
    out = out @ params['w_out'] + params['b_out']
    cout = cout @ params['w_cout'] + params['b_cout']
    return out, cout


# ----------------------------------- init ------------------------------------

def init_params(key, *, dim, context_dim, heads, dim_head):
    inner = heads * dim_head
    ks = jax.random.split(key, 8)

    def linear(k, fan_in, fan_out):
        # nn.Linear-style init, stored as (in, out) so forward is x @ W (+ b).
        bound = 1.0 / math.sqrt(fan_in)
        return jax.random.uniform(k, (fan_in, fan_out), jnp.float32,
                                  -bound, bound)

    bound_o = 1.0 / math.sqrt(inner)
    return {
        'w_qk': linear(ks[0], dim, inner),
        'w_v': linear(ks[1], dim, inner),
        'w_cqk': linear(ks[2], context_dim, inner),
        'w_cv': linear(ks[3], context_dim, inner),
        'w_out': linear(ks[4], inner, dim),
        'b_out': jax.random.uniform(ks[5], (1, dim), jnp.float32,
                                    -bound_o, bound_o),
        'w_cout': linear(ks[6], inner, context_dim),
        'b_cout': jax.random.uniform(ks[7], (1, context_dim), jnp.float32,
                                     -bound_o, bound_o),
    }


if __name__ == "__main__":
    # Small shapes consistent with the module: batch=2, seq=8, context seq=16,
    # dim=32, context_dim=64, heads=4, dim_head=16 (inner_dim=64).
    B, SEQ_I, SEQ_J = 2, 8, 16
    DIM, CTX_DIM = 32, 64
    HEADS, DIM_HEAD = 4, 16

    key = jax.random.PRNGKey(0)
    kp, kx, kc = jax.random.split(key, 3)
    params = init_params(kp, dim=DIM, context_dim=CTX_DIM,
                         heads=HEADS, dim_head=DIM_HEAD)
    x = jax.random.normal(kx, (B, SEQ_I, DIM), jnp.float32)
    context = jax.random.normal(kc, (B, SEQ_J, CTX_DIM), jnp.float32)

    # Default: one batch element per grid step -> 2 parallel steps (v7x-friendly).
    out, context_out = bidirectional_cross_attention(
        x, context, params, heads=HEADS, dim_head=DIM_HEAD, batch_tile=1)
    out, context_out = jax.block_until_ready((out, context_out))

    assert out.shape == (B, SEQ_I, DIM), out.shape
    assert context_out.shape == (B, SEQ_J, CTX_DIM), context_out.shape
    assert bool(jnp.all(jnp.isfinite(out)))
    assert bool(jnp.all(jnp.isfinite(context_out)))

    ref_out, ref_cout = reference_forward(
        x, context, params, heads=HEADS, dim_head=DIM_HEAD)
    assert bool(jnp.allclose(out, ref_out, atol=5e-2, rtol=5e-2))
    assert bool(jnp.allclose(context_out, ref_cout, atol=5e-2, rtol=5e-2))

    # Batch-folded path: 2 batch elements per grid step (amortizes per-step
    # overhead on single-TC v5e/v6e).
    out2, cout2 = bidirectional_cross_attention(
        x, context, params, heads=HEADS, dim_head=DIM_HEAD, batch_tile=2)
    out2, cout2 = jax.block_until_ready((out2, cout2))
    assert bool(jnp.allclose(out2, ref_out, atol=5e-2, rtol=5e-2))
    assert bool(jnp.allclose(cout2, ref_cout, atol=5e-2, rtol=5e-2))

    print("KERNEL_OK")
</pallas_src>

<mosaic_0001>
module attributes {stable_mosaic.version = 11 : i64} {
  func.func @_bidir_cross_attn_kernel(%arg0: i32, %arg1: memref<1x8x32xbf16, #tpu.memory_space<vmem>>, %arg2: memref<1x16x64xbf16, #tpu.memory_space<vmem>>, %arg3: memref<32x64xbf16, #tpu.memory_space<vmem>>, %arg4: memref<32x64xbf16, #tpu.memory_space<vmem>>, %arg5: memref<64x64xbf16, #tpu.memory_space<vmem>>, %arg6: memref<64x64xbf16, #tpu.memory_space<vmem>>, %arg7: memref<64x32xbf16, #tpu.memory_space<vmem>>, %arg8: memref<1x32xf32, #tpu.memory_space<vmem>>, %arg9: memref<64x64xbf16, #tpu.memory_space<vmem>>, %arg10: memref<1x64xf32, #tpu.memory_space<vmem>>, %arg11: memref<1x8x32xf32, #tpu.memory_space<vmem>>, %arg12: memref<1x16x64xf32, #tpu.memory_space<vmem>>) attributes {dimension_semantics = [#tpu.dimension_semantics<parallel>], iteration_bounds = array<i64: 2>, scalar_prefetch = 0 : i64, scratch_operands = 0 : i64, tpu.core_type = #tpu.core_type<tc>, window_params = [{transform_indices = @transform_0, window_bounds = array<i64: 1, 8, 32>}, {transform_indices = @transform_1, window_bounds = array<i64: 1, 16, 64>}, {pipeline_mode = #tpu.pipeline_mode<synchronous>, transform_indices = @transform_2, window_bounds = array<i64: 32, 64>}, {pipeline_mode = #tpu.pipeline_mode<synchronous>, transform_indices = @transform_3, window_bounds = array<i64: 32, 64>}, {pipeline_mode = #tpu.pipeline_mode<synchronous>, transform_indices = @transform_4, window_bounds = array<i64: 64, 64>}, {pipeline_mode = #tpu.pipeline_mode<synchronous>, transform_indices = @transform_5, window_bounds = array<i64: 64, 64>}, {pipeline_mode = #tpu.pipeline_mode<synchronous>, transform_indices = @transform_6, window_bounds = array<i64: 64, 32>}, {pipeline_mode = #tpu.pipeline_mode<synchronous>, transform_indices = @transform_7, window_bounds = array<i64: 1, 32>}, {pipeline_mode = #tpu.pipeline_mode<synchronous>, transform_indices = @transform_8, window_bounds = array<i64: 64, 64>}, {pipeline_mode = #tpu.pipeline_mode<synchronous>, transform_indices = @transform_9, window_bounds = array<i64: 1, 64>}, {transform_indices = @transform_10, window_bounds = array<i64: 1, 8, 32>}, {transform_indices = @transform_11, window_bounds = array<i64: 1, 16, 64>}]} {
    %c0 = arith.constant 0 : index
    %c0_0 = arith.constant 0 : index
    %0 = vector.load %arg3[%c0, %c0_0] : memref<32x64xbf16, #tpu.memory_space<vmem>>, vector<32x64xbf16>
    %c0_1 = arith.constant 0 : index
    %c0_2 = arith.constant 0 : index
    %1 = vector.load %arg4[%c0_1, %c0_2] : memref<32x64xbf16, #tpu.memory_space<vmem>>, vector<32x64xbf16>
    %c0_3 = arith.constant 0 : index
    %c0_4 = arith.constant 0 : index
    %2 = vector.load %arg5[%c0_3, %c0_4] : memref<64x64xbf16, #tpu.memory_space<vmem>>, vector<64x64xbf16>
    %c0_5 = arith.constant 0 : index
    %c0_6 = arith.constant 0 : index
    %3 = vector.load %arg6[%c0_5, %c0_6] : memref<64x64xbf16, #tpu.memory_space<vmem>>, vector<64x64xbf16>
    %c0_7 = arith.constant 0 : index
    %c0_8 = arith.constant 0 : index
    %4 = vector.load %arg7[%c0_7, %c0_8] : memref<64x32xbf16, #tpu.memory_space<vmem>>, vector<64x32xbf16>
    %c0_9 = arith.constant 0 : index
    %c0_10 = arith.constant 0 : index
    %5 = vector.load %arg9[%c0_9, %c0_10] : memref<64x64xbf16, #tpu.memory_space<vmem>>, vector<64x64xbf16>
    %c0_11 = arith.constant 0 : index
    %c0_12 = arith.constant 0 : index
    %6 = vector.load %arg8[%c0_11, %c0_12] : memref<1x32xf32, #tpu.memory_space<vmem>>, vector<1x32xf32>
    %c0_13 = arith.constant 0 : index
    %c0_14 = arith.constant 0 : index
    %7 = vector.load %arg10[%c0_13, %c0_14] : memref<1x64xf32, #tpu.memory_space<vmem>>, vector<1x64xf32>
    %c0_15 = arith.constant 0 : index
    %c0_16 = arith.constant 0 : index
    %c0_17 = arith.constant 0 : index
    %8 = vector.load %arg1[%c0_15, %c0_16, %c0_17] : memref<1x8x32xbf16, #tpu.memory_space<vmem>>, vector<1x8x32xbf16>
    %9 = vector.shape_cast %8 : vector<1x8x32xbf16> to vector<8x32xbf16>
    %c0_18 = arith.constant 0 : index
    %c0_19 = arith.constant 0 : index
    %c0_20 = arith.constant 0 : index
    %10 = vector.load %arg2[%c0_18, %c0_19, %c0_20] : memref<1x16x64xbf16, #tpu.memory_space<vmem>>, vector<1x16x64xbf16>
    %11 = vector.shape_cast %10 : vector<1x16x64xbf16> to vector<16x64xbf16>
    %cst = arith.constant dense<0.000000e+00> : vector<8x64xf32>
    %12 = tpu.matmul %9, %0, %cst {dimension_numbers = #tpu.dot_dimension_numbers<[1], [0], [0], [1], [0, 0, 1, 1], [], []>} : vector<8x32xbf16>, vector<32x64xbf16>, vector<8x64xf32> -> vector<8x64xf32>
    %13 = arith.truncf %12 : vector<8x64xf32> to vector<8x64xbf16>
    %cst_21 = arith.constant dense<0.000000e+00> : vector<8x64xf32>
    %14 = tpu.matmul %9, %1, %cst_21 {dimension_numbers = #tpu.dot_dimension_numbers<[1], [0], [0], [1], [0, 0, 1, 1], [], []>} : vector<8x32xbf16>, vector<32x64xbf16>, vector<8x64xf32> -> vector<8x64xf32>
    %15 = arith.truncf %14 : vector<8x64xf32> to vector<8x64xbf16>
    %cst_22 = arith.constant dense<0.000000e+00> : vector<16x64xf32>
    %16 = tpu.matmul %11, %2, %cst_22 {dimension_numbers = #tpu.dot_dimension_numbers<[1], [0], [0], [1], [0, 0, 1, 1], [], []>} : vector<16x64xbf16>, vector<64x64xbf16>, vector<16x64xf32> -> vector<16x64xf32>
    %17 = arith.truncf %16 : vector<16x64xf32> to vector<16x64xbf16>
    %cst_23 = arith.constant dense<0.000000e+00> : vector<16x64xf32>
    %18 = tpu.matmul %11, %3, %cst_23 {dimension_numbers = #tpu.dot_dimension_numbers<[1], [0], [0], [1], [0, 0, 1, 1], [], []>} : vector<16x64xbf16>, vector<64x64xbf16>, vector<16x64xf32> -> vector<16x64xf32>
    %19 = arith.truncf %18 : vector<16x64xf32> to vector<16x64xbf16>
    %20 = vector.extract_strided_slice %13 {offsets = [0, 0], sizes = [8, 16], strides = [1, 1]} : vector<8x64xbf16> to vector<8x16xbf16>
    %21 = vector.extract_strided_slice %17 {offsets = [0, 0], sizes = [16, 16], strides = [1, 1]} : vector<16x64xbf16> to vector<16x16xbf16>
    %22 = vector.extract_strided_slice %15 {offsets = [0, 0], sizes = [8, 16], strides = [1, 1]} : vector<8x64xbf16> to vector<8x16xbf16>
    %23 = vector.extract_strided_slice %19 {offsets = [0, 0], sizes = [16, 16], strides = [1, 1]} : vector<16x64xbf16> to vector<16x16xbf16>
    %cst_24 = arith.constant dense<0.000000e+00> : vector<8x16xf32>
    %24 = tpu.matmul %20, %21, %cst_24 {dimension_numbers = #tpu.dot_dimension_numbers<[1], [1], [0], [0], [0, 0, 1, 0], [], []>} : vector<8x16xbf16>, vector<16x16xbf16>, vector<8x16xf32> -> vector<8x16xf32>
    %cst_25 = arith.constant dense<0xFF800000> : vector<8xf32>
    %25 = vector.multi_reduction <maximumf>, %24, %cst_25 [1] : vector<8x16xf32> to vector<8xf32>
    %26 = vector.shape_cast %25 : vector<8xf32> to vector<8x1xf32>
    %27 = vector.broadcast %26 : vector<8x1xf32> to vector<8x16xf32>
    %28 = arith.subf %24, %27 : vector<8x16xf32>
    %29 = math.exp %28 : vector<8x16xf32>
    %cst_26 = arith.constant dense<0.000000e+00> : vector<8xf32>
    %30 = vector.multi_reduction <add>, %29, %cst_26 [1] : vector<8x16xf32> to vector<8xf32>
    %31 = vector.shape_cast %30 : vector<8xf32> to vector<8x1xf32>
    %32 = tpu.reciprocal %31 {approx = true} : vector<8x1xf32> -> vector<8x1xf32>
    %33 = vector.broadcast %32 : vector<8x1xf32> to vector<8x16xf32>
    %34 = arith.mulf %29, %33 : vector<8x16xf32>
    %35 = tpu.transpose %24, [1, 0] : vector<8x16xf32> -> vector<16x8xf32>
    %cst_27 = arith.constant dense<0xFF800000> : vector<16xf32>
    %36 = vector.multi_reduction <maximumf>, %35, %cst_27 [1] : vector<16x8xf32> to vector<16xf32>
    %37 = vector.shape_cast %36 : vector<16xf32> to vector<16x1xf32>
    %38 = vector.broadcast %37 : vector<16x1xf32> to vector<16x8xf32>
    %39 = arith.subf %35, %38 : vector<16x8xf32>
    %40 = math.exp %39 : vector<16x8xf32>
    %cst_28 = arith.constant dense<0.000000e+00> : vector<16xf32>
    %41 = vector.multi_reduction <add>, %40, %cst_28 [1] : vector<16x8xf32> to vector<16xf32>
    %42 = vector.shape_cast %41 : vector<16xf32> to vector<16x1xf32>
    %43 = tpu.reciprocal %42 {approx = true} : vector<16x1xf32> -> vector<16x1xf32>
    %44 = vector.broadcast %43 : vector<16x1xf32> to vector<16x8xf32>
    %45 = arith.mulf %40, %44 : vector<16x8xf32>
    %46 = arith.truncf %34 : vector<8x16xf32> to vector<8x16xbf16>
    %cst_29 = arith.constant dense<0.000000e+00> : vector<8x16xf32>
    %47 = tpu.matmul %46, %23, %cst_29 {dimension_numbers = #tpu.dot_dimension_numbers<[1], [0], [0], [1], [0, 0, 1, 1], [], []>} : vector<8x16xbf16>, vector<16x16xbf16>, vector<8x16xf32> -> vector<8x16xf32>
    %48 = arith.truncf %45 : vector<16x8xf32> to vector<16x8xbf16>
    %cst_30 = arith.constant dense<0.000000e+00> : vector<16x16xf32>
    %49 = tpu.matmul %48, %22, %cst_30 {dimension_numbers = #tpu.dot_dimension_numbers<[1], [0], [0], [1], [0, 0, 1, 1], [], []>} : vector<16x8xbf16>, vector<8x16xbf16>, vector<16x16xf32> -> vector<16x16xf32>
    %50 = arith.truncf %47 : vector<8x16xf32> to vector<8x16xbf16>
    %51 = vector.extract_strided_slice %4 {offsets = [0, 0], sizes = [16, 32], strides = [1, 1]} : vector<64x32xbf16> to vector<16x32xbf16>
    %cst_31 = arith.constant dense<0.000000e+00> : vector<8x32xf32>
    %52 = tpu.matmul %50, %51, %cst_31 {dimension_numbers = #tpu.dot_dimension_numbers<[1], [0], [0], [1], [0, 0, 1, 1], [], []>} : vector<8x16xbf16>, vector<16x32xbf16>, vector<8x32xf32> -> vector<8x32xf32>
    %53 = arith.truncf %49 : vector<16x16xf32> to vector<16x16xbf16>
    %54 = vector.extract_strided_slice %5 {offsets = [0, 0], sizes = [16, 64], strides = [1, 1]} : vector<64x64xbf16> to vector<16x64xbf16>
    %cst_32 = arith.constant dense<0.000000e+00> : vector<16x64xf32>
    %55 = tpu.matmul %53, %54, %cst_32 {dimension_numbers = #tpu.dot_dimension_numbers<[1], [0], [0], [1], [0, 0, 1, 1], [], []>} : vector<16x16xbf16>, vector<16x64xbf16>, vector<16x64xf32> -> vector<16x64xf32>
    %56 = vector.extract_strided_slice %13 {offsets = [0, 16], sizes = [8, 16], strides = [1, 1]} : vector<8x64xbf16> to vector<8x16xbf16>
    %57 = vector.extract_strided_slice %17 {offsets = [0, 16], sizes = [16, 16], strides = [1, 1]} : vector<16x64xbf16> to vector<16x16xbf16>
    %58 = vector.extract_strided_slice %15 {offsets = [0, 16], sizes = [8, 16], strides = [1, 1]} : vector<8x64xbf16> to vector<8x16xbf16>
    %59 = vector.extract_strided_slice %19 {offsets = [0, 16], sizes = [16, 16], strides = [1, 1]} : vector<16x64xbf16> to vector<16x16xbf16>
    %cst_33 = arith.constant dense<0.000000e+00> : vector<8x16xf32>
    %60 = tpu.matmul %56, %57, %cst_33 {dimension_numbers = #tpu.dot_dimension_numbers<[1], [1], [0], [0], [0, 0, 1, 0], [], []>} : vector<8x16xbf16>, vector<16x16xbf16>, vector<8x16xf32> -> vector<8x16xf32>
    %cst_34 = arith.constant dense<0xFF800000> : vector<8xf32>
    %61 = vector.multi_reduction <maximumf>, %60, %cst_34 [1] : vector<8x16xf32> to vector<8xf32>
    %62 = vector.shape_cast %61 : vector<8xf32> to vector<8x1xf32>
    %63 = vector.broadcast %62 : vector<8x1xf32> to vector<8x16xf32>
    %64 = arith.subf %60, %63 : vector<8x16xf32>
    %65 = math.exp %64 : vector<8x16xf32>
    %cst_35 = arith.constant dense<0.000000e+00> : vector<8xf32>
    %66 = vector.multi_reduction <add>, %65, %cst_35 [1] : vector<8x16xf32> to vector<8xf32>
    %67 = vector.shape_cast %66 : vector<8xf32> to vector<8x1xf32>
    %68 = tpu.reciprocal %67 {approx = true} : vector<8x1xf32> -> vector<8x1xf32>
    %69 = vector.broadcast %68 : vector<8x1xf32> to vector<8x16xf32>
    %70 = arith.mulf %65, %69 : vector<8x16xf32>
    %71 = tpu.transpose %60, [1, 0] : vector<8x16xf32> -> vector<16x8xf32>
    %cst_36 = arith.constant dense<0xFF800000> : vector<16xf32>
    %72 = vector.multi_reduction <maximumf>, %71, %cst_36 [1] : vector<16x8xf32> to vector<16xf32>
    %73 = vector.shape_cast %72 : vector<16xf32> to vector<16x1xf32>
    %74 = vector.broadcast %73 : vector<16x1xf32> to vector<16x8xf32>
    %75 = arith.subf %71, %74 : vector<16x8xf32>
    %76 = math.exp %75 : vector<16x8xf32>
    %cst_37 = arith.constant dense<0.000000e+00> : vector<16xf32>
    %77 = vector.multi_reduction <add>, %76, %cst_37 [1] : vector<16x8xf32> to vector<16xf32>
    %78 = vector.shape_cast %77 : vector<16xf32> to vector<16x1xf32>
    %79 = tpu.reciprocal %78 {approx = true} : vector<16x1xf32> -> vector<16x1xf32>
    %80 = vector.broadcast %79 : vector<16x1xf32> to vector<16x8xf32>
    %81 = arith.mulf %76, %80 : vector<16x8xf32>
    %82 = arith.truncf %70 : vector<8x16xf32> to vector<8x16xbf16>
    %cst_38 = arith.constant dense<0.000000e+00> : vector<8x16xf32>
    %83 = tpu.matmul %82, %59, %cst_38 {dimension_numbers = #tpu.dot_dimension_numbers<[1], [0], [0], [1], [0, 0, 1, 1], [], []>} : vector<8x16xbf16>, vector<16x16xbf16>, vector<8x16xf32> -> vector<8x16xf32>
    %84 = arith.truncf %81 : vector<16x8xf32> to vector<16x8xbf16>
    %cst_39 = arith.constant dense<0.000000e+00> : vector<16x16xf32>
    %85 = tpu.matmul %84, %58, %cst_39 {dimension_numbers = #tpu.dot_dimension_numbers<[1], [0], [0], [1], [0, 0, 1, 1], [], []>} : vector<16x8xbf16>, vector<8x16xbf16>, vector<16x16xf32> -> vector<16x16xf32>
    %86 = arith.truncf %83 : vector<8x16xf32> to vector<8x16xbf16>
    %87 = vector.extract_strided_slice %4 {offsets = [16, 0], sizes = [16, 32], strides = [1, 1]} : vector<64x32xbf16> to vector<16x32xbf16>
    %cst_40 = arith.constant dense<0.000000e+00> : vector<8x32xf32>
    %88 = tpu.matmul %86, %87, %cst_40 {dimension_numbers = #tpu.dot_dimension_numbers<[1], [0], [0], [1], [0, 0, 1, 1], [], []>} : vector<8x16xbf16>, vector<16x32xbf16>, vector<8x32xf32> -> vector<8x32xf32>
    %89 = arith.truncf %85 : vector<16x16xf32> to vector<16x16xbf16>
    %90 = vector.extract_strided_slice %5 {offsets = [16, 0], sizes = [16, 64], strides = [1, 1]} : vector<64x64xbf16> to vector<16x64xbf16>
    %cst_41 = arith.constant dense<0.000000e+00> : vector<16x64xf32>
    %91 = tpu.matmul %89, %90, %cst_41 {dimension_numbers = #tpu.dot_dimension_numbers<[1], [0], [0], [1], [0, 0, 1, 1], [], []>} : vector<16x16xbf16>, vector<16x64xbf16>, vector<16x64xf32> -> vector<16x64xf32>
    %92 = arith.addf %52, %88 : vector<8x32xf32>
    %93 = arith.addf %55, %91 : vector<16x64xf32>
    %94 = vector.extract_strided_slice %13 {offsets = [0, 32], sizes = [8, 16], strides = [1, 1]} : vector<8x64xbf16> to vector<8x16xbf16>
    %95 = vector.extract_strided_slice %17 {offsets = [0, 32], sizes = [16, 16], strides = [1, 1]} : vector<16x64xbf16> to vector<16x16xbf16>
    %96 = vector.extract_strided_slice %15 {offsets = [0, 32], sizes = [8, 16], strides = [1, 1]} : vector<8x64xbf16> to vector<8x16xbf16>
    %97 = vector.extract_strided_slice %19 {offsets = [0, 32], sizes = [16, 16], strides = [1, 1]} : vector<16x64xbf16> to vector<16x16xbf16>
    %cst_42 = arith.constant dense<0.000000e+00> : vector<8x16xf32>
    %98 = tpu.matmul %94, %95, %cst_42 {dimension_numbers = #tpu.dot_dimension_numbers<[1], [1], [0], [0], [0, 0, 1, 0], [], []>} : vector<8x16xbf16>, vector<16x16xbf16>, vector<8x16xf32> -> vector<8x16xf32>
    %cst_43 = arith.constant dense<0xFF800000> : vector<8xf32>
    %99 = vector.multi_reduction <maximumf>, %98, %cst_43 [1] : vector<8x16xf32> to vector<8xf32>
    %100 = vector.shape_cast %99 : vector<8xf32> to vector<8x1xf32>
    %101 = vector.broadcast %100 : vector<8x1xf32> to vector<8x16xf32>
    %102 = arith.subf %98, %101 : vector<8x16xf32>
    %103 = math.exp %102 : vector<8x16xf32>
    %cst_44 = arith.constant dense<0.000000e+00> : vector<8xf32>
    %104 = vector.multi_reduction <add>, %103, %cst_44 [1] : vector<8x16xf32> to vector<8xf32>
    %105 = vector.shape_cast %104 : vector<8xf32> to vector<8x1xf32>
    %106 = tpu.reciprocal %105 {approx = true} : vector<8x1xf32> -> vector<8x1xf32>
    %107 = vector.broadcast %106 : vector<8x1xf32> to vector<8x16xf32>
    %108 = arith.mulf %103, %107 : vector<8x16xf32>
    %109 = tpu.transpose %98, [1, 0] : vector<8x16xf32> -> vector<16x8xf32>
    %cst_45 = arith.constant dense<0xFF800000> : vector<16xf32>
    %110 = vector.multi_reduction <maximumf>, %109, %cst_45 [1] : vector<16x8xf32> to vector<16xf32>
    %111 = vector.shape_cast %110 : vector<16xf32> to vector<16x1xf32>
    %112 = vector.broadcast %111 : vector<16x1xf32> to vector<16x8xf32>
    %113 = arith.subf %109, %112 : vector<16x8xf32>
    %114 = math.exp %113 : vector<16x8xf32>
    %cst_46 = arith.constant dense<0.000000e+00> : vector<16xf32>
    %115 = vector.multi_reduction <add>, %114, %cst_46 [1] : vector<16x8xf32> to vector<16xf32>
    %116 = vector.shape_cast %115 : vector<16xf32> to vector<16x1xf32>
    %117 = tpu.reciprocal %116 {approx = true} : vector<16x1xf32> -> vector<16x1xf32>
    %118 = vector.broadcast %117 : vector<16x1xf32> to vector<16x8xf32>
    %119 = arith.mulf %114, %118 : vector<16x8xf32>
    %120 = arith.truncf %108 : vector<8x16xf32> to vector<8x16xbf16>
    %cst_47 = arith.constant dense<0.000000e+00> : vector<8x16xf32>
    %121 = tpu.matmul %120, %97, %cst_47 {dimension_numbers = #tpu.dot_dimension_numbers<[1], [0], [0], [1], [0, 0, 1, 1], [], []>} : vector<8x16xbf16>, vector<16x16xbf16>, vector<8x16xf32> -> vector<8x16xf32>
    %122 = arith.truncf %119 : vector<16x8xf32> to vector<16x8xbf16>
    %cst_48 = arith.constant dense<0.000000e+00> : vector<16x16xf32>
    %123 = tpu.matmul %122, %96, %cst_48 {dimension_numbers = #tpu.dot_dimension_numbers<[1], [0], [0], [1], [0, 0, 1, 1], [], []>} : vector<16x8xbf16>, vector<8x16xbf16>, vector<16x16xf32> -> vector<16x16xf32>
    %124 = arith.truncf %121 : vector<8x16xf32> to vector<8x16xbf16>
    %125 = vector.extract_strided_slice %4 {offsets = [32, 0], sizes = [16, 32], strides = [1, 1]} : vector<64x32xbf16> to vector<16x32xbf16>
    %cst_49 = arith.constant dense<0.000000e+00> : vector<8x32xf32>
    %126 = tpu.matmul %124, %125, %cst_49 {dimension_numbers = #tpu.dot_dimension_numbers<[1], [0], [0], [1], [0, 0, 1, 1], [], []>} : vector<8x16xbf16>, vector<16x32xbf16>, vector<8x32xf32> -> vector<8x32xf32>
    %127 = arith.truncf %123 : vector<16x16xf32> to vector<16x16xbf16>
    %128 = vector.extract_strided_slice %5 {offsets = [32, 0], sizes = [16, 64], strides = [1, 1]} : vector<64x64xbf16> to vector<16x64xbf16>
    %cst_50 = arith.constant dense<0.000000e+00> : vector<16x64xf32>
    %129 = tpu.matmul %127, %128, %cst_50 {dimension_numbers = #tpu.dot_dimension_numbers<[1], [0], [0], [1], [0, 0, 1, 1], [], []>} : vector<16x16xbf16>, vector<16x64xbf16>, vector<16x64xf32> -> vector<16x64xf32>
    %130 = arith.addf %92, %126 : vector<8x32xf32>
    %131 = arith.addf %93, %129 : vector<16x64xf32>
    %132 = vector.extract_strided_slice %13 {offsets = [0, 48], sizes = [8, 16], strides = [1, 1]} : vector<8x64xbf16> to vector<8x16xbf16>
    %133 = vector.extract_strided_slice %17 {offsets = [0, 48], sizes = [16, 16], strides = [1, 1]} : vector<16x64xbf16> to vector<16x16xbf16>
    %134 = vector.extract_strided_slice %15 {offsets = [0, 48], sizes = [8, 16], strides = [1, 1]} : vector<8x64xbf16> to vector<8x16xbf16>
    %135 = vector.extract_strided_slice %19 {offsets = [0, 48], sizes = [16, 16], strides = [1, 1]} : vector<16x64xbf16> to vector<16x16xbf16>
    %cst_51 = arith.constant dense<0.000000e+00> : vector<8x16xf32>
    %136 = tpu.matmul %132, %133, %cst_51 {dimension_numbers = #tpu.dot_dimension_numbers<[1], [1], [0], [0], [0, 0, 1, 0], [], []>} : vector<8x16xbf16>, vector<16x16xbf16>, vector<8x16xf32> -> vector<8x16xf32>
    %cst_52 = arith.constant dense<0xFF800000> : vector<8xf32>
    %137 = vector.multi_reduction <maximumf>, %136, %cst_52 [1] : vector<8x16xf32> to vector<8xf32>
    %138 = vector.shape_cast %137 : vector<8xf32> to vector<8x1xf32>
    %139 = vector.broadcast %138 : vector<8x1xf32> to vector<8x16xf32>
    %140 = arith.subf %136, %139 : vector<8x16xf32>
    %141 = math.exp %140 : vector<8x16xf32>
    %cst_53 = arith.constant dense<0.000000e+00> : vector<8xf32>
    %142 = vector.multi_reduction <add>, %141, %cst_53 [1] : vector<8x16xf32> to vector<8xf32>
    %143 = vector.shape_cast %142 : vector<8xf32> to vector<8x1xf32>
    %144 = tpu.reciprocal %143 {approx = true} : vector<8x1xf32> -> vector<8x1xf32>
    %145 = vector.broadcast %144 : vector<8x1xf32> to vector<8x16xf32>
    %146 = arith.mulf %141, %145 : vector<8x16xf32>
    %147 = tpu.transpose %136, [1, 0] : vector<8x16xf32> -> vector<16x8xf32>
    %cst_54 = arith.constant dense<0xFF800000> : vector<16xf32>
    %148 = vector.multi_reduction <maximumf>, %147, %cst_54 [1] : vector<16x8xf32> to vector<16xf32>
    %149 = vector.shape_cast %148 : vector<16xf32> to vector<16x1xf32>
    %150 = vector.broadcast %149 : vector<16x1xf32> to vector<16x8xf32>
    %151 = arith.subf %147, %150 : vector<16x8xf32>
    %152 = math.exp %151 : vector<16x8xf32>
    %cst_55 = arith.constant dense<0.000000e+00> : vector<16xf32>
    %153 = vector.multi_reduction <add>, %152, %cst_55 [1] : vector<16x8xf32> to vector<16xf32>
    %154 = vector.shape_cast %153 : vector<16xf32> to vector<16x1xf32>
    %155 = tpu.reciprocal %154 {approx = true} : vector<16x1xf32> -> vector<16x1xf32>
    %156 = vector.broadcast %155 : vector<16x1xf32> to vector<16x8xf32>
    %157 = arith.mulf %152, %156 : vector<16x8xf32>
    %158 = arith.truncf %146 : vector<8x16xf32> to vector<8x16xbf16>
    %cst_56 = arith.constant dense<0.000000e+00> : vector<8x16xf32>
    %159 = tpu.matmul %158, %135, %cst_56 {dimension_numbers = #tpu.dot_dimension_numbers<[1], [0], [0], [1], [0, 0, 1, 1], [], []>} : vector<8x16xbf16>, vector<16x16xbf16>, vector<8x16xf32> -> vector<8x16xf32>
    %160 = arith.truncf %157 : vector<16x8xf32> to vector<16x8xbf16>
    %cst_57 = arith.constant dense<0.000000e+00> : vector<16x16xf32>
    %161 = tpu.matmul %160, %134, %cst_57 {dimension_numbers = #tpu.dot_dimension_numbers<[1], [0], [0], [1], [0, 0, 1, 1], [], []>} : vector<16x8xbf16>, vector<8x16xbf16>, vector<16x16xf32> -> vector<16x16xf32>
    %162 = arith.truncf %159 : vector<8x16xf32> to vector<8x16xbf16>
    %163 = vector.extract_strided_slice %4 {offsets = [48, 0], sizes = [16, 32], strides = [1, 1]} : vector<64x32xbf16> to vector<16x32xbf16>
    %cst_58 = arith.constant dense<0.000000e+00> : vector<8x32xf32>
    %164 = tpu.matmul %162, %163, %cst_58 {dimension_numbers = #tpu.dot_dimension_numbers<[1], [0], [0], [1], [0, 0, 1, 1], [], []>} : vector<8x16xbf16>, vector<16x32xbf16>, vector<8x32xf32> -> vector<8x32xf32>
    %165 = arith.truncf %161 : vector<16x16xf32> to vector<16x16xbf16>
    %166 = vector.extract_strided_slice %5 {offsets = [48, 0], sizes = [16, 64], strides = [1, 1]} : vector<64x64xbf16> to vector<16x64xbf16>
    %cst_59 = arith.constant dense<0.000000e+00> : vector<16x64xf32>
    %167 = tpu.matmul %165, %166, %cst_59 {dimension_numbers = #tpu.dot_dimension_numbers<[1], [0], [0], [1], [0, 0, 1, 1], [], []>} : vector<16x16xbf16>, vector<16x64xbf16>, vector<16x64xf32> -> vector<16x64xf32>
    %168 = arith.addf %130, %164 : vector<8x32xf32>
    %169 = arith.addf %131, %167 : vector<16x64xf32>
    %170 = vector.broadcast %6 : vector<1x32xf32> to vector<8x32xf32>
    %171 = arith.addf %168, %170 : vector<8x32xf32>
    %c0_60 = arith.constant 0 : index
    %c0_61 = arith.constant 0 : index
    %c0_62 = arith.constant 0 : index
    %172 = vector.load %arg11[%c0_60, %c0_61, %c0_62] : memref<1x8x32xf32, #tpu.memory_space<vmem>>, vector<1x8x32xf32>
    %173 = vector.shape_cast %172 : vector<1x8x32xf32> to vector<8x32xf32>
    %174 = vector.shape_cast %171 : vector<8x32xf32> to vector<1x8x32xf32>
    tpu.vector_store %arg11[%c0_60, %c0_61, %c0_62], %174 {strides = array<i32>} : memref<1x8x32xf32, #tpu.memory_space<vmem>>, vector<1x8x32xf32>,
    %175 = vector.broadcast %7 : vector<1x64xf32> to vector<16x64xf32>
    %176 = arith.addf %169, %175 : vector<16x64xf32>
    %c0_63 = arith.constant 0 : index
    %c0_64 = arith.constant 0 : index
    %c0_65 = arith.constant 0 : index
    %177 = vector.load %arg12[%c0_63, %c0_64, %c0_65] : memref<1x16x64xf32, #tpu.memory_space<vmem>>, vector<1x16x64xf32>
    %178 = vector.shape_cast %177 : vector<1x16x64xf32> to vector<16x64xf32>
    %179 = vector.shape_cast %176 : vector<16x64xf32> to vector<1x16x64xf32>
    tpu.vector_store %arg12[%c0_63, %c0_64, %c0_65], %179 {strides = array<i32>} : memref<1x16x64xf32, #tpu.memory_space<vmem>>, vector<1x16x64xf32>,
    return
  }
  func.func @transform_0(%arg0: i32) -> (i32, i32, i32) {
    %c0_i32 = arith.constant 0 : i32
    %c0_i32_0 = arith.constant 0 : i32
    %c0_i32_1 = arith.constant 0 : i32
    return %arg0, %c0_i32, %c0_i32_0 : i32, i32, i32
  }
  func.func @transform_1(%arg0: i32) -> (i32, i32, i32) {
    %c0_i32 = arith.constant 0 : i32
    %c0_i32_0 = arith.constant 0 : i32
    %c0_i32_1 = arith.constant 0 : i32
    return %arg0, %c0_i32, %c0_i32_0 : i32, i32, i32
  }
  func.func @transform_2(%arg0: i32) -> (i32, i32) {
    %c0_i32 = arith.constant 0 : i32
    %c0_i32_0 = arith.constant 0 : i32
    %c0_i32_1 = arith.constant 0 : i32
    return %c0_i32, %c0_i32_0 : i32, i32
  }
  func.func @transform_3(%arg0: i32) -> (i32, i32) {
    %c0_i32 = arith.constant 0 : i32
    %c0_i32_0 = arith.constant 0 : i32
    %c0_i32_1 = arith.constant 0 : i32
    return %c0_i32, %c0_i32_0 : i32, i32
  }
  func.func @transform_4(%arg0: i32) -> (i32, i32) {
    %c0_i32 = arith.constant 0 : i32
    %c0_i32_0 = arith.constant 0 : i32
    %c0_i32_1 = arith.constant 0 : i32
    return %c0_i32, %c0_i32_0 : i32, i32
  }
  func.func @transform_5(%arg0: i32) -> (i32, i32) {
    %c0_i32 = arith.constant 0 : i32
    %c0_i32_0 = arith.constant 0 : i32
    %c0_i32_1 = arith.constant 0 : i32
    return %c0_i32, %c0_i32_0 : i32, i32
  }
  func.func @transform_6(%arg0: i32) -> (i32, i32) {
    %c0_i32 = arith.constant 0 : i32
    %c0_i32_0 = arith.constant 0 : i32
    %c0_i32_1 = arith.constant 0 : i32
    return %c0_i32, %c0_i32_0 : i32, i32
  }
  func.func @transform_7(%arg0: i32) -> (i32, i32) {
    %c0_i32 = arith.constant 0 : i32
    %c0_i32_0 = arith.constant 0 : i32
    %c0_i32_1 = arith.constant 0 : i32
    return %c0_i32, %c0_i32_0 : i32, i32
  }
  func.func @transform_8(%arg0: i32) -> (i32, i32) {
    %c0_i32 = arith.constant 0 : i32
    %c0_i32_0 = arith.constant 0 : i32
    %c0_i32_1 = arith.constant 0 : i32
    return %c0_i32, %c0_i32_0 : i32, i32
  }
  func.func @transform_9(%arg0: i32) -> (i32, i32) {
    %c0_i32 = arith.constant 0 : i32
    %c0_i32_0 = arith.constant 0 : i32
    %c0_i32_1 = arith.constant 0 : i32
    return %c0_i32, %c0_i32_0 : i32, i32
  }
  func.func @transform_10(%arg0: i32) -> (i32, i32, i32) {
    %c0_i32 = arith.constant 0 : i32
    %c0_i32_0 = arith.constant 0 : i32
    %c0_i32_1 = arith.constant 0 : i32
    return %arg0, %c0_i32, %c0_i32_0 : i32, i32, i32
  }
  func.func @transform_11(%arg0: i32) -> (i32, i32, i32) {
    %c0_i32 = arith.constant 0 : i32
    %c0_i32_0 = arith.constant 0 : i32
    %c0_i32_1 = arith.constant 0 : i32
    return %arg0, %c0_i32, %c0_i32_0 : i32, i32, i32
  }
}

</mosaic_0001>

<bundles_post_ra>
// kernel: tpu_custom_call.1
= control target key start
LH: loop header
LB: loop body
LE: loop exit
PB: predicated region body
PF: predicated region fallthrough
CT: control target
= control target key end

     0   :  { %s3523_s0 = inlined_call_operand.hbm [shape: bf16[2,8,32], index: 0, kind: input, shape index: {}]   ;;  %s3524_s1 = inlined_call_operand.vmem [shape: bf16[2,16,64], index: 1, kind: input, shape index: {}]   ;;  %s3525_s2 = inlined_call_operand.hbm [shape: bf16[32,64], index: 2, kind: input, shape index: {}]   ;;  %s3526_s3 = inlined_call_operand.hbm [shape: bf16[32,64], index: 3, kind: input, shape index: {}]   ;;  %s3527_s4 = inlined_call_operand.vmem [shape: bf16[64,64], index: 4, kind: input, shape index: {}]   ;;  %s3528_s5 = inlined_call_operand.hbm [shape: bf16[64,64], index: 5, kind: input, shape index: {}]   ;;  %s3529_s6 = inlined_call_operand.vmem [shape: bf16[64,32], index: 6, kind: input, shape index: {}]   ;;  %s3530_s7 = inlined_call_operand.vmem [shape: f32[1,32], index: 7, kind: input, shape index: {}]   ;;  %s3531_s8 = inlined_call_operand.hbm [shape: bf16[64,64], index: 8, kind: input, shape index: {}]   ;;  %s3532_s9 = inlined_call_operand.vmem [shape: f32[1,64], index: 9, kind: input, shape index: {}]   ;;  %s3533_s10 = inlined_call_operand.hbm [shape: f32[2,8,32], index: 10, kind: output, shape index: {0}]   ;;  %s3534_s11 = inlined_call_operand.hbm [shape: f32[2,16,64], index: 11, kind: output, shape index: {1}]  }
   0x1   :  { %3540 = sst [smem:[#allocation21_spill]] %s3525_s2 }
   0x2   :  { %3541 = sst [smem:[#allocation22_spill]] %s3526_s3 }
   0x3   :  { %3542 = sst [smem:[#allocation23_spill]] %s3528_s5 }
   0x4   :  { %3543 = sst [smem:[#allocation24_spill]] %s3531_s8 }
   0x5   :  { %17 = vsyncpa [#allocation3], 0 }
   0x6   :  { %19 = vsyncpa [#allocation3 + $0x1], 0 }
   0x7   :  { %20 = vsyncpa [#allocation6], 0 }
   0x8   :  { %21 = vsyncpa [#allocation9], 0 }
   0x9   :  { %22 = vsyncpa [#allocation4], 0 }
   0xa   :  { %24 = vsyncpa [#allocation4 + $0x1], 0 }
   0xb   :  { %25 = vsyncpa [#allocation13], 0 }
   0xc   :  { %27 = vsyncpa [#allocation13 + $0x1], 0  ;;  %s3022_s17 = smov 0   ;;  %s3024_s18 = smov 0  }
   0xd   :  { %s3026_s19 = smov 0   ;;  %s3028_s20 = smov 0  }
   0xe LB: > { %3544 = sst [smem:[#allocation19_spill]] %s2940_s19  ;;  %s2946_s21 = smov [#allocation5]   ;;  %s2944_s20 = sphi %s3028_s20, %s3570_s20   ;;  %s2940_s19 = sphi %s3026_s19, %s3567_s19   ;;  %s2936_s18 = sphi %s3024_s18, %s3569_s18   ;;  %s2932_s17 = sphi %s3022_s17, %s3568_s17  }
   0xf   : > { %s322_s22 = sshll.u32 %s2946_s21, 4  ;;  %s3043_s23 = sadd.s32 4294967295, %s2944_s20   ;;  %s323_s22 = int_to_ptr.vmem [resolvable:$true] %s322_s22 }
  0x10   : > { %p2250_p0 = scmp.ge.s32.totalorder %s2944_s20, 1  ;;  %p3535_p1 = scmp.eq.s32.totalorder %s3043_s23, 0 }
  0x11   : > { %p310_p2 = scmp.lt.s32.totalorder %s2944_s20, 3  ;;  %s2947_s25 = smov [#allocation8]  }
  0x12   : > { %s351_s26 = sshll.u32 %s2947_s25, 4  ;;  %s2948_s28 = smov [#allocation7]   ;;  %s3061_s26 = int_to_ptr.vmem [resolvable:$true] %s351_s26 }
  0x13   : > { %p3048_p3 = pnand %p2250_p0, %p310_p2  ;;  %s335_s29 = sshll.u32 %s2948_s28, 4  ;;  %s3063_s29 = int_to_ptr.vmem [resolvable:$true] %s335_s29 }
  0x14   : > { %s2721_s30 = scalar_lea.vmem %s323_s22, 256  ;;  %p2729_p11 = scmp.lt.s32.totalorder %s323_s22, %s323_s22 }
  0x15   : > { %s3545_s24 = scalar_select %p3048_p3, 1, 0 }
  0x16   : > { %p2562_p5 = pneg %p3048_p3  ;;  %p2722_p8 = scmp.ne.s32.totalorder %s323_s22, %s2721_s30 }
  0x17   : > { %p2730_p12 = scmp.lt.s32.totalorder %s2721_s30, %s2721_s30 }
  0x18   : > { %p3057_p6 = pnand %p2562_p5, %p3535_p1 }
  0x19   : > { %p2731_p13 = por %p2730_p12, %p2729_p11 }
  0x1a   : > { %p2712_p7 = pneg %p3057_p6 }
  0x1c   : > { %p2724_p9 = pnand %p2722_p8, %p2712_p7 }
  0x1e   : > { %p2725_p10 = pneg %p2724_p9 }
  0x20   : > { %p2732_p0 = pnand %p2731_p13, %p2725_p10 }
  0x22   : > { %2735 = shalt.err (!%p2732_p0)
}
  0x23   : > { %s2949_s12 = smov 64   ;;  %s2950_s13 = smov 4  }
  0x24   : > { %s3547_s2 = sld [smem:[#allocation21_spill]]  ;;  %s2747_s16 = scalar_lea.vmem %s3061_s26, 512 }
  0x25   : > { %p2748_p2 = scmp.ne.s32.totalorder %s3061_s26, %s2747_s16  ;;  %p2755_p9 = scmp.lt.s32.totalorder %s3061_s26, %s3061_s26 }
  0x26   : > { %p2756_p10 = scmp.lt.s32.totalorder %s2747_s16, %s2747_s16 }
  0x27   : > { %p2750_p5 = pnand %p2748_p2, %p2712_p7 }
  0x28   : > { %p2757_p11 = por %p2756_p10, %p2755_p9 }
  0x29   : > { %p2751_p8 = pneg %p2750_p5 }
  0x2a   : > { %2565 = dma.hbm_to_vmem [thread:$0]  (!%p3057_p6), %s3547_s2, 256, %s323_s22, [#allocation6], %s2949_s12, %s2949_s12, %s2950_s13  }
  0x2b   : > { %p2758_p12 = pnand %p2757_p11, %p2751_p8 }
  0x2d   : > { %2761 = shalt.err (!%p2758_p12)
}
  0x2e   : > { %s3548_s5 = sld [smem:[#allocation23_spill]]  ;;  %s2773_s25 = scalar_lea.vmem %s3063_s29, 256 }
  0x2f   : > { %p2774_p13 = scmp.ne.s32.totalorder %s3063_s29, %s2773_s25  ;;  %p2781_p5 = scmp.lt.s32.totalorder %s3063_s29, %s3063_s29 }
  0x30   : > { %p2782_p8 = scmp.lt.s32.totalorder %s2773_s25, %s2773_s25 }
  0x31   : > { %p2776_p0 = pnand %p2774_p13, %p2712_p7 }
  0x32   : > { %p2783_p9 = por %p2782_p8, %p2781_p5 }
  0x33   : > { %p2777_p2 = pneg %p2776_p0 }
  0x34   : > { %2571 = dma.hbm_to_vmem [thread:$0]  (!%p3057_p6), %s3548_s5, 512, %s3061_s26, [#allocation9], %s2949_s12, %s2949_s12, %s2950_s13  }
  0x35   : > { %p2784_p10 = pnand %p2783_p9, %p2777_p2 }
  0x37   : > { %2787 = shalt.err (!%p2784_p10)
}
  0x38   : > { %s3549_s3 = sld [smem:[#allocation22_spill]]  ;;  %s2951_s30 = smov [#allocation10]  }
  0x39   : > { %s370_s14 = sshll.u32 %s2951_s30, 4  ;;  %s371_s14 = int_to_ptr.vmem [resolvable:$true] %s370_s14 }
  0x3a   : > { %s2799_s15 = scalar_lea.vmem %s371_s14, 512  ;;  %p2807_p0 = scmp.lt.s32.totalorder %s371_s14, %s371_s14 }
  0x3b   : > { %p2800_p11 = scmp.ne.s32.totalorder %s371_s14, %s2799_s15  ;;  %p2808_p2 = scmp.lt.s32.totalorder %s2799_s15, %s2799_s15 }
  0x3d   : > { %p2802_p12 = pnand %p2800_p11, %p2712_p7  ;;  %p2809_p5 = por %p2808_p2, %p2807_p0 }
  0x3e   : > { %2568 = dma.hbm_to_vmem [thread:$0]  (!%p3057_p6), %s3549_s3, 256, %s3063_s29, [#allocation6], %s2949_s12, %s2949_s12, %s2950_s13  }
  0x3f   : > { %p2803_p13 = pneg %p2802_p12 }
  0x41   : > { %p2810_p8 = pnand %p2809_p5, %p2803_p13 }
  0x43   : > { %2813 = shalt.err (!%p2810_p8)
}
  0x44   : > { %s3550_s8 = sld [smem:[#allocation24_spill]]  ;;  %s2249_s27 = sadd.s32 4294967294, %s2944_s20  }
  0x45   : > { %s3123_s21 = sadd.s32 1, %s2944_s20   ;;  %s40_s25 = sadd.s32 1, %s2940_s19 }
  0x46   : > { %s37_s22 = ssub.s32 %s2944_s20, %s3123_s21  ;;  %p47_p9 = scmp.ne.s32.totalorder %s2940_s19, %s2936_s18 }
  0x47   : > { %p38_p7 = scmp.eq.s32.totalorder %s37_s22, 0  ;;  %p48_p10 = scmp.eq.s32.totalorder %s2944_s20, 0 }
  0x48   : > { %p53_p11 = scmp.ne.s32.totalorder %s2936_s18, %s2932_s17  ;;  %p271_p13 = scmp.eq.s32.totalorder %s3043_s23, 1 }
  0x49   : > { %s3134_s28 = scalar_select %p38_p7, %s2940_s19, %s40_s25  }
  0x4a   : > { %2574 = dma.hbm_to_vmem [thread:$0]  (!%p3057_p6), %s3550_s8, 512, %s371_s14, [#allocation9], %s2949_s12, %s2949_s12, %s2950_s13  }
  0x4b   : > { %3551 = sst [smem:[#allocation20_spill]] %s3134_s28  ;;  %p3136_p12 = por %p48_p10, %p47_p9 }
  0x4c   : > { %p3142_p6 = por %p3535_p1, %p53_p11  ;;  %p277_p0 = scmp.eq.s32.totalorder %s2249_s27, 1 }
  0x4d   : > { %p2590_p2 = scmp.lt.s32.totalorder %s2944_s20, 2  ;;  %s387_s13 = sand.u32 1, %s2940_s19  }
  0x4e   : > { %s3553_s12 = scalar_select %p3142_p6, 1, 0 }
  0x4f   : > { %p3149_p5 = por %p271_p13, %p47_p9  ;;  %p3153_p8 = por %p277_p0, %p53_p11 }
  0x50   : > { %s2256_s15 = sshll.u32 %s387_s13, 2  ;;  %s2257_s29 = sshll.u32 %s2944_s20, 6 }
  0x51   : > { %s3554_s30 = scalar_select %p3149_p5, 1, 0 }
  0x52   : > { %s3555_s14 = scalar_select %p3153_p8, 1, 0 }
  0x53   : > { %s3161_s25 = scalar_lea.hbm %s3523_s0, %s2257_s29  ;;  %s391_s27 = scalar_lea.vmem [#allocation2], %s2256_s15 }
  0x54   : > { %s398_s2 = sshll.u32 %s391_s27, 4  ;;  %p3165_p7 = pnand %p2590_p2, %p3136_p12  ;;  %s399_s2 = int_to_ptr.vmem [resolvable:$true] %s398_s2 }
  0x55   : > { %s388_s5 = scalar_lea.sflag [#allocation3], %s387_s13  ;;  %s2814_s8 = scalar_lea.hbm %s3161_s25, 64 }
  0x56   : > { %p2815_p9 = scmp.ne.s32.totalorder %s3161_s25, %s2814_s8  ;;  %p2816_p10 = pneg %p3165_p7 }
  0x57   : > { %s2819_s22 = scalar_lea.hbm %s3523_s0, 128  ;;  %p2820_p0 = scmp.lt.s32.totalorder %s3161_s25, %s3523_s0 }
  0x58   : > { %p2817_p11 = pnand %p2816_p10, %p2815_p9  ;;  %p2821_p12 = scmp.lt.s32.totalorder %s2819_s22, %s2814_s8 }
  0x5a   : > { %p2818_p13 = pneg %p2817_p11  ;;  %p2822_p2 = por %p2821_p12, %p2820_p0 }
  0x5c   : > { %p2823_p4 = pnand %p2822_p2, %p2818_p13 }
  0x5e   : > { %2826 = shalt.err (!%p2823_p4)
}
  0x5f   : > { %s2827_s26 = scalar_lea.vmem %s399_s2, 64  ;;  %s2952_s13 = smov [#allocation2]  }
  0x60   : > { %p2828_p1 = scmp.ne.s32.totalorder %s399_s2, %s2827_s26  ;;  %s2832_s28 = sshll.u32 %s2952_s13, 4  ;;  %s2833_s28 = int_to_ptr.vmem [resolvable:$false] %s2832_s28 }
  0x61   : > { %s2834_s19 = scalar_lea.vmem %s2833_s28, 128  ;;  %p2835_p9 = scmp.lt.s32.totalorder %s399_s2, %s2833_s28 }
  0x62   : > { %p2830_p8 = pnand %p2828_p1, %p2816_p10  ;;  %p2836_p11 = scmp.lt.s32.totalorder %s2834_s19, %s2827_s26 }
  0x64   : > { %p2831_p5 = pneg %p2830_p8  ;;  %p2837_p6 = por %p2836_p11, %p2835_p9 }
  0x66   : > { %p2838_p3 = pnand %p2837_p6, %p2831_p5 }
  0x68   : > { %2841 = shalt.err (!%p2838_p3)
}
  0x69   : > { %2578 = dma.hbm_to_vmem [thread:$0]  (!%p3165_p7), %s3161_s25, 64, %s399_s2, %s388_s5  }
  0x6a   : > { %p3557_p13 = scmp.ne.s32.totalorder %s3545_s24, 0 }
  0x6b   : > { %s3186_s8 = sand.u32 (!%p3557_p13), 1, %s2936_s18   ;;  %p3558_p1 = scmp.ne.s32.totalorder (!%p3557_p13), %s3553_s12, 0 }
  0x6c   : > { %415 = sbr.rel (%p3557_p13) target bundleno = 3409 (0xd51), region = 60  ;;  %s2259_s29 = sshll.u32 (!%p3557_p13), %s3186_s8, 2 }
  0x6d   : > { %s418_s16 = scalar_lea.sflag (!%p3557_p13), [#allocation3], %s3186_s8  ;;  %s421_s28 = scalar_lea.vmem (!%p3557_p13), [#allocation2], %s2259_s29 }
  0x71   : > { %2911 = dma.done.wait (%p3558_p1), %s418_s16, 64  }
  0x72   : > { %2913 = vsyncadd (%p3558_p1), %s418_s16, 4294967232  ;;  %p3559_p3 = scmp.eq.s32.totalorder %s3043_s23, 0 }
  0x74   : > { %2915 = dma.done.wait (%p3559_p3), [#allocation6], 512   ;;  %p3560_p4 = pmov %p3559_p3 }
  0x75   : > { %p3561_p6 = pmov %p3559_p3 }
  0x76   : > { %2917 = vsyncadd (%p3560_p4), [#allocation6], 4294966784 }
  0x77   : > { %2919 = dma.done.wait (%p3561_p6), [#allocation9], 1024   ;;  %p3562_p5 = pmov %p3559_p3 }
  0x78   : > { %v2953_v0 = vmov 0.0   ;;  %vm2954_vm0 = vmmov 0   ;;  %p486_p8 = scmp.lt.s32.totalorder %s3043_s23, 1  ;;  %v2641_v1 = vld [vmem:[#allocation5 + $0x8] sm:$0xff]   ;;  %v2642_v2 = vld [vmem:[#allocation5] sm:$0xff]   ;;  %vm549_vm1 = vcmask 261120  }
  0x79   : > { %2921 = vsyncadd (%p3562_p5), [#allocation9], 4294966272  ;;  %2380 = vmatprep.subr.bf16.mxu0 %v2953_v0  ;;  %2384 = vmatprep.mubr.msk.bf16.mxu0 %vm2954_vm0, %v2953_v0  ;;  %v534_v3 = vld [vmem:[%s421_s28] sm:$0xf]  ;;  %v2643_v4 = vld [vmem:[%s3527_s4 + $0x18] sm:$0xff]   ;;  %vm676_vm2 = vcmask 523264  }
  0x7a   : > { %2388 = vmatprep.subr.bf16.mxu1 %v2953_v0  ;;  %2392 = vmatprep.mubr.msk.bf16.mxu1 %vm2954_vm0, %v2953_v0  ;;  %s487_s2 = scalar_select %p486_p8, %s3043_s23, 1  ;;  %v2644_v5 = vld [vmem:[%s3527_s4 + $0x10] sm:$0xff]   ;;  %v2645_v6 = vld [vmem:[%s3527_s4 + $0x8] sm:$0xff]   ;;  %v2646_v7 = vld [vmem:[%s3527_s4] sm:$0xff]   ;;  %vm788_vm3 = vcmask 130048   ;;  %vm949_vm4 = vcmask 1043456  }
  0x7b   : > { %2381 = vmatpush3.bf16.msra.mxu0 %v2641_v1  ;;  %s2955_s16 = smov 112   ;;  %v2648_v20 = vld [vmem:[#allocation7 + $0x8] sm:$0xff]   ;;  %v2649_v21 = vld [vmem:[#allocation7] sm:$0xff]   ;;  %v2652_v24 = vld [vmem:[#allocation8 + $0x8] sm:$0xff]   ;;  %vm878_vm5 = vcmask 64512   ;;  %s2956_s28 = smov 96  }
  0x7c   : > { %s2322_s3 = sshll.u32 %s487_s2, 3  ;;  %2382 = vmatprep.subr.bf16.mxu0 %v2953_v0  ;;  %2389 = vmatpush3.bf16.msra.mxu1 %v2648_v20  ;;  %v2650_v22 = vld [vmem:[#allocation8 + $0x18] sm:$0xff]   ;;  %v2651_v23 = vld [vmem:[#allocation8 + $0x10] sm:$0xff]   ;;  %v2653_v25 = vld [vmem:[#allocation8] sm:$0xff]   ;;  %s2264_s27 = sshll.u32 %s3186_s8, 3 }
  0x7d   : > { %s490_s24 = scalar_lea.vmem %s3524_s1, %s2322_s3  ;;  %2390 = vmatprep.subr.bf16.mxu1 %v2953_v0  ;;  %s2317_s29 = sshll.u32 %s3043_s23, 7 }
  0x7e   : > { %v2647_v8 = vld [vmem:[%s490_s24] sm:$0xff]   ;;  %s2957_s24 = smov 80   ;;  %s3440_s5 = scalar_lea.hbm %s3533_s10, %s2317_s29 }
  0x7f   : > { %2383 = vmatpush3.bf16.msra.mxu0 %v2642_v2  ;;  %s2063_s19 = scalar_lea.sflag [#allocation4], %s3186_s8  ;;  %p3563_p10 = scmp.ne.s32.totalorder %s3554_s30, 0 }
  0x80   : > { %2396 = vmatprep.subr.bf16.mxu0 %v2953_v0  ;;  %2391 = vmatpush3.bf16.msra.mxu1 %v2649_v21  ;;  %s2958_s12 = smov [#allocation11]  }
  0x81   : > { %2408 = vmatprep.subr.bf16.mxu1 %v2953_v0  ;;  %s2846_s25 = sshll.u32 %s2958_s12, 4  ;;  %s2847_s25 = int_to_ptr.vmem [resolvable:$false] %s2846_s25 }
  0x82   : > { %2385 = vmatmul.mubr.msk.bf16.vlgmr.msra.gmra.mxu0 %vm549_vm1, %v534_v3  ;;  %s2848_s22 = scalar_lea.vmem %s2847_s25, 256 }
  0x83   : > { %2397 = vmatpush3.bf16.msra.mxu0 %v2643_v4  ;;  %2404 = vmatprep.mubr.msk.bf16.mxu0 %vm2954_vm0, %v2953_v0 }
  0x84   : > { %2398 = vmatprep.subr.bf16.mxu0 %v2953_v0  ;;  %2393 = vmatmul.mubr.msk.bf16.vlgmr.msra.gmra.mxu1 %vm549_vm1, %v534_v3 }
  0x85   : > { %2409 = vmatpush3.bf16.msra.mxu1 %v2650_v22  ;;  %2416 = vmatprep.mubr.msk.bf16.mxu1 %vm2954_vm0, %v2953_v0 }
  0x86   : > { %2410 = vmatprep.subr.bf16.mxu1 %v2953_v0 }
  0x87   : > { %2399 = vmatpush3.bf16.msra.mxu0 %v2644_v5 }
  0x88   : > { %2400 = vmatprep.subr.bf16.mxu0 %v2953_v0 }
  0x89   : > { %2411 = vmatpush3.bf16.msra.mxu1 %v2651_v23 }
  0x8a   : > { %2412 = vmatprep.subr.bf16.mxu1 %v2953_v0 }
  0x8b   : > { %2401 = vmatpush3.bf16.msra.mxu0 %v2645_v6 }
  0x8c   : > { %2402 = vmatprep.subr.bf16.mxu0 %v2953_v0 }
  0x8d   : > { %2413 = vmatpush3.bf16.msra.mxu1 %v2652_v24 }
  0x8e   : > { %2414 = vmatprep.subr.bf16.mxu1 %v2953_v0 }
  0x8f   : > { %2403 = vmatpush3.bf16.msra.mxu0 %v2646_v7 }
  0x90   : > { %2420 = vmatprep.subr.bf16.mxu0 %v2953_v0 }
  0x91   : > { %2415 = vmatpush3.bf16.msra.mxu1 %v2653_v25 }
  0x92   : > { %2405 = vmatmul.mubr.msk.bf16.vlgmr.msra.gmra.mxu0 %vm676_vm2, %v2647_v8  ;;  %2426 = vmatprep.subr.bf16.mxu1 %v2953_v0 }
  0x93   : > { %2422 = vmatprep.mubr.msk.bf16.mxu0 %vm2954_vm0, %v2953_v0 }
  0x94   : > { %2417 = vmatmul.mubr.msk.bf16.vlgmr.msra.gmra.mxu1 %vm676_vm2, %v2647_v8 }
  0x95   : > { %2428 = vmatprep.mubr.msk.bf16.mxu1 %vm2954_vm0, %v2953_v0 }
 0x142   : > { %v587_v9 = vpop.f32.mrf.mxu0 }
 0x143   : > { %v3243_v19 = vpack.c.bf16 %v587_v9, %v587_v9 }
 0x144   : > { %v2386_v10 = vpop.f32.mrf.mxu0  ;;  %v640_v31 = vpop.f32.mrf.mxu1 }
 0x145   : > { %v3265_v32 = vpack.c.bf16 %v640_v31, %v640_v31 }
 0x146   : > { %v590_v11 = vpop.f32.mrf.mxu0  ;;  %v2394_v33 = vpop.f32.mrf.mxu1 }
 0x147   : > { %v951_v34 = vsel %vm949_vm4, %v3265_v32, 0 }
 0x148   : > { %v2387_v12 = vpop.f32.mrf.mxu0  ;;  %v643_v35 = vpop.f32.mrf.mxu1 }
 0x14a   : > { %v2395_v36 = vpop.f32.mrf.mxu1 }
 0x152   : > { %v714_v13 = vpop.f32.mrf.mxu0 }
 0x154   : > { %v2406_v14 = vpop.f32.mrf.mxu0  ;;  %v780_v37 = vpop.f32.mrf.mxu1 }
 0x156   : > { %v717_v15 = vpop.f32.mrf.mxu0  ;;  %v2418_v38 = vpop.f32.mrf.mxu1 }
 0x157   : > { %v3237_v16 = vpack.c.bf16 %v717_v15, %v714_v13 }
 0x158   : > { %v2407_v17 = vpop.f32.mrf.mxu0  ;;  %v783_v44 = vpop.f32.mrf.mxu1 }
 0x159   : > { %1000 = vrot.lane.b32.xlu1 %v3237_v16, %s2955_s16  ;;  %v793_v18 = vsel %vm788_vm3, %v3237_v16, 0  ;;  %v3271_v45 = vpack.c.bf16 %v783_v44, %v780_v37 }
 0x15a   : > { %2421 = vmatpush3.bf16.xpose.msra.mxu0 %v793_v18  ;;  %v2419_v46 = vpop.f32.mrf.mxu1 }
 0x15b   : > { %2432 = vmatprep.subr.bf16.mxu0 %v2953_v0  ;;  %2427 = vmatpush3.bf16.msra.mxu1 %v3271_v45  ;;  %v2654_v46 = vld [vmem:[%s3529_s6 + $0x8] sm:$0xff]  }
 0x15c   : > { %2438 = vmatprep.subr.bf16.mxu1 %v2953_v0 }
 0x15d   : > { %997 = vrot.lane.b32.xlu1 %v3243_v19, %s2955_s16 }
 0x161   : > { %2423 = vmatmul.mubr.msk.bf16.vlgmr.msra.gmra.mxu0 %vm788_vm3, %v3243_v19 }
 0x162   : > { %2434 = vmatprep.mubr.msk.bf16.mxu0 %vm2954_vm0, %v2953_v0  ;;  %2433 = vmatpush3.bf16.msra.mxu0 %v951_v34 }
 0x163   : > { %2444 = vmatprep.subr.bf16.mxu0 %v2953_v0 }
 0x1cb   : > { %v1001_v50 = vpop.permute.xlu1 %1000 }
 0x1cc   : > { %v1006_v52 = vsel %vm788_vm3, %v1001_v50, 0 }
 0x1cf   : > { %v998_v53 = vpop.permute.xlu1 %997 }
 0x221   : > { %v829_v26 = vpop.f32.mrf.mxu0 }
 0x222   : > { %v835_v27 = vsel %vm788_vm3, %v829_v26, -inf }
 0x223   : > { %836 = vmax.xlane.f32.xlu0 %v835_v27  ;;  %v2424_v28 = vpop.f32.mrf.mxu0 }
 0x225   : > { %v832_v29 = vpop.f32.mrf.mxu0 }
 0x227   : > { %v2425_v30 = vpop.f32.mrf.mxu0 }
 0x2ac   : > { %v837_v39 = vpop.xlane.xlu0 %836 }
 0x2ad   : > { %v838_v40 = vsub.f32 %v829_v26, %v837_v39 }
 0x2af   : > { %v839_v41 = vmul.f32 1.442695, %v838_v40 }
 0x2b1   : > { %2662 = vpow2.f32 %v839_v41 }
 0x2be   : > { %v2663_v42 = vpop.eup %2662 }
 0x2bf   : > { %v841_v43 = vsel %vm788_vm3, %v2663_v42, 0.0 }
 0x2c0   : > { %842 = vadd.xlane.f32.xlu0 %v841_v43 }
 0x2ed   : > { %846 = vxpose.xlu0.b32.start.end [1/1] (short) (narrow) %v829_v26, 16 }
 0x349   : > { %v843_v47 = vpop.xlane.xlu0 %842 }
 0x34a   : > { %2664 = vrcp.f32 %v843_v47 }
 0x357   : > { %v2665_v48 = vpop.eup %2664 }
 0x358   : > { %v845_v49 = vmul.f32 %v2665_v48, %v2663_v42 }
 0x35a   : > { %v901_v51 = vpack.c.bf16 %v845_v49, %v845_v49 }
 0x35c   : > { %2429 = vmatmul.mubr.msk.bf16.vlgmr.msra.gmra.mxu1 %vm788_vm3, %v901_v51 }
 0x35d   : > { %2439 = vmatpush3.bf16.xpose.msra.mxu1 %v1006_v52  ;;  %2440 = vmatprep.mubr.msk.bf16.mxu1 %vm2954_vm0, %v2953_v0 }
 0x35e   : > { %2450 = vmatprep.subr.bf16.mxu1 %v2953_v0 }
 0x364   : > { %2441 = vmatmul.mubr.msk.bf16.vlgmr.msra.gmra.mxu1 %vm788_vm3, %v998_v53 }
 0x365   : > { %2452 = vmatprep.mubr.msk.bf16.mxu1 %vm2954_vm0, %v2953_v0 }
 0x369   : > { %v862_v54 = vpop.trf.xlu0 }
 0x36a   : > { %v879_v55 = vsel %vm878_vm5, %v862_v54, -inf }
 0x36b   : > { %880 = vmax.xlane.f32.xlu1 %v879_v55 }
 0x36d   : > { %v863_v56 = vpop.trf.xlu0 }
 0x36e   : > { %v882_v57 = vsel %vm878_vm5, %v863_v56, -inf }
 0x36f   : > { %883 = vmax.xlane.f32.xlu1 %v882_v57 }
 0x3f4   : > { %v881_v58 = vpop.xlane.xlu1 %880 }
 0x3f5   : > { %v885_v1 = vsub.f32 %v862_v54, %v881_v58 }
 0x3f7   : > { %v887_v2 = vmul.f32 1.442695, %v885_v1 }
 0x3f8   : > { %v884_v59 = vpop.xlane.xlu1 %883 }
 0x3f9   : > { %v886_v60 = vsub.f32 %v863_v56, %v884_v59  ;;  %v2655_v56 = vld [vmem:[%s3529_s6] sm:$0xff]  }
 0x3fb   : > { %v889_v61 = vmul.f32 1.442695, %v886_v60 }
 0x3fd   : > { %2666 = vpow2.f32 %v889_v61 }
 0x3fe   : > { %2668 = vpow2.f32 %v887_v2 }
 0x40a   : > { %v2667_v62 = vpop.eup %2666 }
 0x40b   : > { %v894_v63 = vsel %vm878_vm5, %v2667_v62, 0.0  ;;  %v2669_v7 = vpop.eup %2668 }
 0x40c   : > { %895 = vadd.xlane.f32.xlu0 %v894_v63  ;;  %v891_v11 = vsel %vm878_vm5, %v2669_v7, 0.0 }
 0x41c   : > { %v3286_v3 = vpop.f32.mrf.mxu1 }
 0x41d   : > { %v994_v63 = vpack.c.bf16 %v3286_v3, %v3286_v3 }
 0x41e   : > { %v2430_v4 = vpop.f32.mrf.mxu1 }
 0x420   : > { %v942_v5 = vpop.f32.mrf.mxu1 }
 0x422   : > { %v2431_v6 = vpop.f32.mrf.mxu1 }
 0x424   : > { %v1042_v8 = vpop.f32.mrf.mxu1 }
 0x425   : > { %v1048_v9 = vsel %vm788_vm3, %v1042_v8, -inf }
 0x426   : > { %v2442_v10 = vpop.f32.mrf.mxu1  ;;  %1049 = vmax.xlane.f32.xlu1 %v1048_v9 }
 0x428   : > { %v1045_v12 = vpop.f32.mrf.mxu1 }
 0x42a   : > { %v2443_v13 = vpop.f32.mrf.mxu1  ;;  %892 = vadd.xlane.f32.xlu1 %v891_v11 }
 0x495   : > { %v896_v15 = vpop.xlane.xlu0 %895 }
 0x496   : > { %2670 = vrcp.f32 %v896_v15 }
 0x4a3   : > { %v2671_v21 = vpop.eup %2670 }
 0x4a4   : > { %v900_v26 = vmul.f32 %v2671_v21, %v2667_v62 }
 0x4af   : > { %v1050_v14 = vpop.xlane.xlu1 %1049 }
 0x4b0   : > { %v1051_v17 = vsub.f32 %v1042_v8, %v1050_v14 }
 0x4b2   : > { %v1052_v18 = vmul.f32 1.442695, %v1051_v17 }
 0x4b3   : > { %v893_v20 = vpop.xlane.xlu1 %892 }
 0x4b4   : > { %2672 = vpow2.f32 %v1052_v18 }
 0x4b5   : > { %2674 = vrcp.f32 %v893_v20 }
 0x4c1   : > { %v2673_v22 = vpop.eup %2672 }
 0x4c2   : > { %v2675_v23 = vpop.eup %2674  ;;  %v1054_v24 = vsel %vm788_vm3, %v2673_v22, 0.0 }
 0x4c3   : > { %1055 = vadd.xlane.f32.xlu1 %v1054_v24  ;;  %v899_v25 = vmul.f32 %v2675_v23, %v2669_v7 }
 0x4c5   : > { %v945_v27 = vpack.c.bf16 %v900_v26, %v899_v25 }
 0x4c7   : > { %2435 = vmatmul.mubr.msk.bf16.vlgmr.msra.gmra.mxu0 %vm878_vm5, %v945_v27  ;;  %v2656_v27 = vld [vmem:[#allocation10 + $0x8] sm:$0xff]  }
 0x4c8   : > { %2446 = vmatprep.mubr.msk.bf16.mxu0 %vm2954_vm0, %v2953_v0 }
 0x4d4   : > { %1115 = vrot.lane.b32.xlu1 %v3271_v45, %s2955_s16 }
 0x4d8   : > { %1414 = vrot.lane.b32.xlu1 %v3237_v16, %s2956_s28 }
 0x4dc   : > { %1412 = vrot.lane.b32.xlu1 %v3243_v19, %s2956_s28 }
 0x505   : > { %1059 = vxpose.xlu1.b32.start.end [1/1] (short) (narrow) %v1042_v8, 16 }
 0x54c   : > { %v1056_v28 = vpop.xlane.xlu1 %1055 }
 0x54d   : > { %2676 = vrcp.f32 %v1056_v28 }
 0x550   : > { %v1116_v29 = vpop.permute.xlu1 %1115 }
 0x551   : > { %2445 = vmatpush3.bf16.msra.mxu0 %v1116_v29 }
 0x552   : > { %2456 = vmatprep.subr.bf16.mxu0 %v2953_v0 }
 0x554   : > { %v1415_v34 = vpop.permute.xlu1 %1414 }
 0x555   : > { %v1420_v1 = vsel %vm788_vm3, %v1415_v34, 0 }
 0x558   : > { %v1413_v35 = vpop.permute.xlu1 %1412 }
 0x55a   : > { %v2677_v30 = vpop.eup %2676 }
 0x55b   : > { %v1058_v31 = vmul.f32 %v2677_v30, %v2673_v22 }
 0x55d   : > { %v1113_v33 = vpack.c.bf16 %v1058_v31, %v1058_v31 }
 0x55f   : > { %2447 = vmatmul.mubr.msk.bf16.vlgmr.msra.gmra.mxu0 %vm788_vm3, %v1113_v33 }
 0x560   : > { %2458 = vmatprep.mubr.msk.bf16.mxu0 %vm2954_vm0, %v2953_v0  ;;  %2457 = vmatpush3.bf16.msra.mxu0 %v2654_v46 }
 0x561   : > { %2468 = vmatprep.subr.bf16.mxu0 %v2953_v0 }
 0x581   : > { %v1075_v36 = vpop.trf.xlu1 }
 0x582   : > { %v1091_v37 = vsel %vm878_vm5, %v1075_v36, -inf }
 0x583   : > { %1092 = vmax.xlane.f32.xlu0 %v1091_v37 }
 0x585   : > { %v1076_v38 = vpop.trf.xlu1 }
 0x586   : > { %v1094_v39 = vsel %vm878_vm5, %v1076_v38, -inf }
 0x587   : > { %v3306_v40 = vpop.f32.mrf.mxu0  ;;  %1095 = vmax.xlane.f32.xlu0 %v1094_v39 }
 0x589   : > { %v2436_v41 = vpop.f32.mrf.mxu0 }
 0x58b   : > { %v3308_v42 = vpop.f32.mrf.mxu0 }
 0x58c   : > { %v995_v43 = vpack.c.bf16 %v3308_v42, %v3306_v40 }
 0x58d   : > { %v2437_v44 = vpop.f32.mrf.mxu0 }
 0x60c   : > { %v1093_v47 = vpop.xlane.xlu0 %1092 }
 0x60d   : > { %v1097_v48 = vsub.f32 %v1075_v36, %v1093_v47 }
 0x60f   : > { %v1099_v49 = vmul.f32 1.442695, %v1097_v48 }
 0x610   : > { %v1096_v50 = vpop.xlane.xlu0 %1095 }
 0x611   : > { %2678 = vpow2.f32 %v1099_v49  ;;  %v1098_v51 = vsub.f32 %v1076_v38, %v1096_v50  ;;  %v2658_v49 = vld [vmem:[%s3529_s6 + $0x10] sm:$0xff]  }
 0x613   : > { %v1101_v52 = vmul.f32 1.442695, %v1098_v51 }
 0x615   : > { %2680 = vpow2.f32 %v1101_v52 }
 0x61e   : > { %v2679_v53 = vpop.eup %2678 }
 0x61f   : > { %v1155_v54 = vpop.f32.mrf.mxu0  ;;  %v1103_v55 = vsel %vm878_vm5, %v2679_v53, 0.0 }
 0x620   : > { %v1212_v57 = vpack.c.bf16 %v1155_v54, %v1155_v54  ;;  %1104 = vadd.xlane.f32.xlu0 %v1103_v55 }
 0x621   : > { %v2448_v58 = vpop.f32.mrf.mxu0 }
 0x622   : > { %v2681_v59 = vpop.eup %2680  ;;  %2459 = vmatmul.mubr.msk.bf16.vlgmr.msra.gmra.mxu0 %vm788_vm3, %v1212_v57 }
 0x623   : > { %v1158_v60 = vpop.f32.mrf.mxu0  ;;  %2469 = vmatpush3.bf16.msra.mxu0 %v2655_v56  ;;  %v1106_v61 = vsel %vm878_vm5, %v2681_v59, 0.0  ;;  %2470 = vmatprep.mubr.msk.bf16.mxu0 %vm2954_vm0, %v2953_v0 }
 0x624   : > { %1107 = vadd.xlane.f32.xlu0 %v1106_v61  ;;  %2480 = vmatprep.subr.bf16.mxu0 %v2953_v0 }
 0x625   : > { %v2449_v62 = vpop.f32.mrf.mxu0 }
 0x62a   : > { %2471 = vmatmul.mubr.msk.bf16.vlgmr.msra.gmra.mxu0 %vm788_vm3, %v994_v63 }
 0x62b   : > { %2481 = vmatpush3.bf16.xpose.msra.mxu0 %v1420_v1  ;;  %2482 = vmatprep.mubr.msk.bf16.mxu0 %vm2954_vm0, %v2953_v0 }
 0x62c   : > { %2492 = vmatprep.subr.bf16.mxu0 %v2953_v0 }
 0x632   : > { %2483 = vmatmul.mubr.msk.bf16.vlgmr.msra.gmra.mxu0 %vm788_vm3, %v1413_v35  ;;  %v2657_v35 = vld [vmem:[#allocation10] sm:$0xff]  }
 0x633   : > { %2494 = vmatprep.mubr.msk.bf16.mxu0 %vm2954_vm0, %v2953_v0 }
 0x63a   : > { %1163 = vrot.lane.b32.xlu0 %v3265_v32, %s2955_s16  ;;  %s478_s16 = scalar_lea.vmem [#allocation11], %s2264_s27 }
 0x6a9   : > { %v1105_v2 = vpop.xlane.xlu0 %1104 }
 0x6aa   : > { %2682 = vrcp.f32 %v1105_v2 }
 0x6ad   : > { %v1108_v3 = vpop.xlane.xlu0 %1107 }
 0x6ae   : > { %2684 = vrcp.f32 %v1108_v3 }
 0x6b1   : > { %v1164_v4 = vpop.permute.xlu0 %1163 }
 0x6b2   : > { %v1169_v5 = vsel %vm949_vm4, %v1164_v4, 0 }
 0x6b3   : > { %2451 = vmatpush3.bf16.msra.mxu1 %v1169_v5 }
 0x6b4   : > { %2462 = vmatprep.subr.bf16.mxu1 %v2953_v0 }
 0x6b7   : > { %v2683_v6 = vpop.eup %2682 }
 0x6b8   : > { %v1111_v8 = vmul.f32 %v2683_v6, %v2679_v53 }
 0x6bb   : > { %v2685_v7 = vpop.eup %2684 }
 0x6bc   : > { %v1112_v9 = vmul.f32 %v2685_v7, %v2681_v59 }
 0x6be   : > { %v1161_v10 = vpack.c.bf16 %v1112_v9, %v1111_v8 }
 0x6c0   : > { %2453 = vmatmul.mubr.msk.bf16.vlgmr.msra.gmra.mxu1 %vm878_vm5, %v1161_v10 }
 0x6c1   : > { %2464 = vmatprep.mubr.msk.bf16.mxu1 %vm2954_vm0, %v2953_v0  ;;  %2463 = vmatpush3.bf16.msra.mxu1 %v2656_v27 }
 0x6c2   : > { %2474 = vmatprep.subr.bf16.mxu1 %v2953_v0 }
 0x6e2   : > { %v1256_v11 = vpop.f32.mrf.mxu0 }
 0x6e4   : > { %v2460_v12 = vpop.f32.mrf.mxu0 }
 0x6e6   : > { %v1259_v13 = vpop.f32.mrf.mxu0 }
 0x6e8   : > { %v2461_v14 = vpop.f32.mrf.mxu0 }
 0x6ea   : > { %v1356_v15 = vpop.f32.mrf.mxu0 }
 0x6eb   : > { %v3342_v17 = vadd.f32 %v1356_v15, %v1256_v11 }
 0x6ec   : > { %v2472_v18 = vpop.f32.mrf.mxu0 }
 0x6ee   : > { %v1359_v20 = vpop.f32.mrf.mxu0 }
 0x6f0   : > { %v2473_v21 = vpop.f32.mrf.mxu0 }
 0x6f2   : > { %v1456_v22 = vpop.f32.mrf.mxu0 }
 0x6f3   : > { %v1462_v23 = vsel %vm788_vm3, %v1456_v22, -inf }
 0x6f4   : > { %1463 = vmax.xlane.f32.xlu1 %v1462_v23  ;;  %v2484_v24 = vpop.f32.mrf.mxu0 }
 0x6f6   : > { %v1459_v25 = vpop.f32.mrf.mxu0 }
 0x6f8   : > { %v2485_v26 = vpop.f32.mrf.mxu0 }
 0x6f9   : > { %v2659_v26 = vld [vmem:[#allocation10 + $0x10] sm:$0xff]  }
 0x705   : > { %1528 = vrot.lane.b32.xlu1 %v3271_v45, %s2956_s28 }
 0x709   : > { %1728 = vrot.lane.b32.xlu1 %v3243_v19, %s2957_s24 }
 0x732   : > { %1473 = vxpose.xlu1.b32.start.end [1/1] (short) (narrow) %v1456_v22, 16 }
 0x77d   : > { %v1464_v28 = vpop.xlane.xlu1 %1463 }
 0x77e   : > { %v1465_v29 = vsub.f32 %v1456_v22, %v1464_v28 }
 0x780   : > { %v1466_v30 = vmul.f32 1.442695, %v1465_v29  ;;  %v1205_v31 = vpop.f32.mrf.mxu1 }
 0x781   : > { %v1529_v38 = vpop.permute.xlu1 %1528 }
 0x782   : > { %2686 = vpow2.f32 %v1466_v30  ;;  %v2454_v33 = vpop.f32.mrf.mxu1 }
 0x784   : > { %v1208_v34 = vpop.f32.mrf.mxu1 }
 0x785   : > { %v1262_v36 = vpack.c.bf16 %v1208_v34, %v1205_v31  ;;  %v1729_v41 = vpop.permute.xlu1 %1728 }
 0x786   : > { %v2455_v37 = vpop.f32.mrf.mxu1 }
 0x787   : > { %2465 = vmatmul.mubr.msk.bf16.vlgmr.msra.gmra.mxu1 %vm788_vm3, %v1262_v36 }
 0x788   : > { %2475 = vmatpush3.bf16.msra.mxu1 %v2657_v35  ;;  %2476 = vmatprep.mubr.msk.bf16.mxu1 %vm2954_vm0, %v2953_v0 }
 0x789   : > { %2486 = vmatprep.subr.bf16.mxu1 %v2953_v0 }
 0x78f   : > { %v2687_v19 = vpop.eup %2686  ;;  %2477 = vmatmul.mubr.msk.bf16.vlgmr.msra.gmra.mxu1 %vm788_vm3, %v995_v43 }
 0x790   : > { %2487 = vmatpush3.bf16.msra.mxu1 %v1529_v38  ;;  %v1468_v39 = vsel %vm788_vm3, %v2687_v19, 0.0  ;;  %2488 = vmatprep.mubr.msk.bf16.mxu1 %vm2954_vm0, %v2953_v0 }
 0x791   : > { %1469 = vadd.xlane.f32.xlu0 %v1468_v39  ;;  %2498 = vmatprep.subr.bf16.mxu1 %v2953_v0 }
 0x7a7   : > { %1730 = vrot.lane.b32.xlu0 %v3237_v16, %s2957_s24 }
 0x7ae   : > { %v1489_v44 = vpop.trf.xlu1 }
 0x7af   : > { %v1505_v46 = vsel %vm878_vm5, %v1489_v44, -inf }
 0x7b2   : > { %v1490_v47 = vpop.trf.xlu1 }
 0x7b3   : > { %v1508_v40 = vsel %vm878_vm5, %v1490_v47, -inf }
 0x7c6   : > { %1506 = vmax.xlane.f32.xlu0 %v1505_v46 }
 0x7ca   : > { %1509 = vmax.xlane.f32.xlu0 %v1508_v40 }
 0x81a   : > { %v1470_v42 = vpop.xlane.xlu0 %1469 }
 0x81b   : > { %2688 = vrcp.f32 %v1470_v42 }
 0x81e   : > { %v1731_v52 = vpop.permute.xlu0 %1730 }
 0x81f   : > { %v1736_v12 = vsel %vm788_vm3, %v1731_v52, 0 }
 0x828   : > { %v2689_v43 = vpop.eup %2688 }
 0x829   : > { %v1472_v48 = vmul.f32 %v2689_v43, %v2687_v19 }
 0x82b   : > { %v1527_v50 = vpack.c.bf16 %v1472_v48, %v1472_v48 }
 0x82d   : > { %2489 = vmatmul.mubr.msk.bf16.vlgmr.msra.gmra.mxu1 %vm788_vm3, %v1527_v50 }
 0x82e   : > { %2499 = vmatpush3.bf16.msra.mxu1 %v2658_v49  ;;  %2500 = vmatprep.mubr.msk.bf16.mxu1 %vm2954_vm0, %v2953_v0 }
 0x82f   : > { %2510 = vmatprep.subr.bf16.mxu1 %v2953_v0 }
 0x847   : > { %v1306_v16 = vpop.f32.mrf.mxu1 }
 0x849   : > { %v2466_v51 = vpop.f32.mrf.mxu1 }
 0x84b   : > { %v1309_v53 = vpop.f32.mrf.mxu1 }
 0x84d   : > { %v2467_v54 = vpop.f32.mrf.mxu1 }
 0x84f   : > { %v1405_v55 = vpop.f32.mrf.mxu1  ;;  %v1507_v56 = vpop.xlane.xlu0 %1506 }
 0x850   : > { %v3373_v57 = vadd.f32 %v1405_v55, %v1306_v16  ;;  %v1511_v58 = vsub.f32 %v1489_v44, %v1507_v56 }
 0x851   : > { %v2478_v59 = vpop.f32.mrf.mxu1 }
 0x852   : > { %v1513_v60 = vmul.f32 1.442695, %v1511_v58 }
 0x853   : > { %v1408_v61 = vpop.f32.mrf.mxu1  ;;  %v1510_v62 = vpop.xlane.xlu0 %1509 }
 0x854   : > { %2690 = vpow2.f32 %v1513_v60  ;;  %v3375_v63 = vadd.f32 %v1408_v61, %v1309_v53  ;;  %v1512_v1 = vsub.f32 %v1490_v47, %v1510_v62 }
 0x855   : > { %v2479_v2 = vpop.f32.mrf.mxu1 }
 0x856   : > { %v1515_v3 = vmul.f32 1.442695, %v1512_v1 }
 0x858   : > { %2692 = vpow2.f32 %v1515_v3 }
 0x861   : > { %v2691_v4 = vpop.eup %2690 }
 0x862   : > { %v1517_v5 = vsel %vm878_vm5, %v2691_v4, 0.0 }
 0x863   : > { %1518 = vadd.xlane.f32.xlu0 %v1517_v5 }
 0x865   : > { %v2693_v6 = vpop.eup %2692 }
 0x866   : > { %v1520_v7 = vsel %vm878_vm5, %v2693_v6, 0.0 }
 0x867   : > { %1521 = vadd.xlane.f32.xlu1 %v1520_v7 }
 0x879   : > { %1575 = vrot.lane.b32.xlu0 %v3265_v32, %s2956_s28  ;;  %s2081_s28 = sshll.u32 %s478_s16, 4  ;;  %s3442_s28 = int_to_ptr.vmem [resolvable:$true] %s2081_s28 }
 0x87a   : > { %p2849_p2 = scmp.lt.s32.totalorder %s3442_s28, %s2847_s25 }
 0x8ec   : > { %v1519_v8 = vpop.xlane.xlu0 %1518 }
 0x8ed   : > { %v1568_v9 = vpop.f32.mrf.mxu1  ;;  %2694 = vrcp.f32 %v1519_v8 }
 0x8ee   : > { %v1624_v10 = vpack.c.bf16 %v1568_v9, %v1568_v9 }
 0x8ef   : > { %v2490_v11 = vpop.f32.mrf.mxu1 }
 0x8f0   : > { %2501 = vmatmul.mubr.msk.bf16.vlgmr.msra.gmra.mxu1 %vm788_vm3, %v1624_v10  ;;  %v1522_v13 = vpop.xlane.xlu1 %1521  ;;  %v1576_v14 = vpop.permute.xlu0 %1575 }
 0x8f1   : > { %2511 = vmatpush3.bf16.xpose.msra.mxu1 %v1736_v12  ;;  %2696 = vrcp.f32 %v1522_v13  ;;  %v1581_v15 = vsel %vm949_vm4, %v1576_v14, 0  ;;  %v1571_v18 = vpop.f32.mrf.mxu1  ;;  %2512 = vmatprep.mubr.msk.bf16.mxu1 %vm2954_vm0, %v2953_v0 }
 0x8f2   : > { %2493 = vmatpush3.bf16.msra.mxu0 %v1581_v15  ;;  %2522 = vmatprep.subr.bf16.mxu1 %v2953_v0  ;;  %v2660_v15 = vld [vmem:[%s3529_s6 + $0x18] sm:$0xff]   ;;  %v2661_v18 = vld [vmem:[#allocation10 + $0x18] sm:$0xff]  }
 0x8f3   : > { %v2491_v20 = vpop.f32.mrf.mxu1  ;;  %2504 = vmatprep.subr.bf16.mxu0 %v2953_v0 }
 0x8f8   : > { %2513 = vmatmul.mubr.msk.bf16.vlgmr.msra.gmra.mxu1 %vm788_vm3, %v1729_v41 }
 0x8f9   : > { %2524 = vmatprep.mubr.msk.bf16.mxu1 %vm2954_vm0, %v2953_v0 }
 0x8fa   : > { %v2695_v21 = vpop.eup %2694 }
 0x8fb   : > { %v1525_v23 = vmul.f32 %v2695_v21, %v2691_v4 }
 0x8fe   : > { %v2697_v22 = vpop.eup %2696 }
 0x8ff   : > { %v1526_v24 = vmul.f32 %v2697_v22, %v2693_v6 }
 0x901   : > { %v1574_v25 = vpack.c.bf16 %v1526_v24, %v1525_v23 }
 0x903   : > { %2495 = vmatmul.mubr.msk.bf16.vlgmr.msra.gmra.mxu0 %vm878_vm5, %v1574_v25 }
 0x904   : > { %2506 = vmatprep.mubr.msk.bf16.mxu0 %vm2954_vm0, %v2953_v0  ;;  %2505 = vmatpush3.bf16.msra.mxu0 %v2659_v26 }
 0x905   : > { %2516 = vmatprep.subr.bf16.mxu0 %v2953_v0 }
 0x9b0   : > { %v1668_v27 = vpop.f32.mrf.mxu1 }
 0x9b1   : > { %v3396_v28 = vadd.f32 %v1668_v27, %v3342_v17 }
 0x9b2   : > { %v2502_v29 = vpop.f32.mrf.mxu1 }
 0x9b4   : > { %v1671_v30 = vpop.f32.mrf.mxu1 }
 0x9b5   : > { %v2313_v30 = vld [vmem:[%s3530_s7] ss:$0 sm:$0xff] }
 0x9b6   : > { %v2503_v31 = vpop.f32.mrf.mxu1 }
 0x9b8   : > { %v1772_v33 = vpop.f32.mrf.mxu1 }
 0x9b9   : > { %1789 = vxpose.xlu0.b32.start.end [1/1] (short) (narrow) %v1772_v33, 16  ;;  %v1778_v40 = vsel %vm788_vm3, %v1772_v33, -inf }
 0x9ba   : > { %v2514_v34 = vpop.f32.mrf.mxu1 }
 0x9bc   : > { %v1775_v35 = vpop.f32.mrf.mxu1 }
 0x9be   : > { %v2515_v36 = vpop.f32.mrf.mxu1 }
 0x9c3   : > { %v1617_v37 = vpop.f32.mrf.mxu0 }
 0x9c5   : > { %v2496_v19 = vpop.f32.mrf.mxu0 }
 0x9c7   : > { %v1620_v38 = vpop.f32.mrf.mxu0 }
 0x9c8   : > { %v1674_v39 = vpack.c.bf16 %v1620_v38, %v1617_v37 }
 0x9c9   : > { %v2497_v41 = vpop.f32.mrf.mxu0 }
 0x9ca   : > { %2507 = vmatmul.mubr.msk.bf16.vlgmr.msra.gmra.mxu0 %vm788_vm3, %v1674_v39 }
 0x9cb   : > { %2518 = vmatprep.mubr.msk.bf16.mxu0 %vm2954_vm0, %v2953_v0 }
 0xa35   : > { %v1805_v17 = vpop.trf.xlu0 }
 0xa36   : > { %v1821_v44 = vsel %vm878_vm5, %v1805_v17, -inf }
 0xa37   : > { %1822 = vmax.xlane.f32.xlu1 %v1821_v44 }
 0xa39   : > { %v1806_v46 = vpop.trf.xlu0 }
 0xa3a   : > { %v1824_v47 = vsel %vm878_vm5, %v1806_v46, -inf }
 0xa3b   : > { %1825 = vmax.xlane.f32.xlu1 %v1824_v47 }
 0xa3f   : > { %1779 = vmax.xlane.f32.xlu1 %v1778_v40 }
 0xa8a   : > { %v1718_v42 = vpop.f32.mrf.mxu0 }
 0xa8b   : > { %v3405_v43 = vadd.f32 %v1718_v42, %v3373_v57 }
 0xa8c   : > { %v2508_v48 = vpop.f32.mrf.mxu0 }
 0xa8e   : > { %v1721_v49 = vpop.f32.mrf.mxu0 }
 0xa8f   : > { %v3408_v50 = vadd.f32 %v1721_v49, %v3375_v63 }
 0xa90   : > { %v2509_v16 = vpop.f32.mrf.mxu0 }
 0xac0   : > { %v1823_v51 = vpop.xlane.xlu1 %1822 }
 0xac1   : > { %v1827_v52 = vsub.f32 %v1805_v17, %v1823_v51 }
 0xac3   : > { %v1829_v53 = vmul.f32 1.442695, %v1827_v52 }
 0xac4   : > { %v1826_v54 = vpop.xlane.xlu1 %1825 }
 0xac5   : > { %2698 = vpow2.f32 %v1829_v53  ;;  %v1828_v62 = vsub.f32 %v1806_v46, %v1826_v54 }
 0xac7   : > { %v1831_v63 = vmul.f32 1.442695, %v1828_v62 }
 0xac8   : > { %v1780_v55 = vpop.xlane.xlu1 %1779 }
 0xac9   : > { %v1781_v56 = vsub.f32 %v1772_v33, %v1780_v55 }
 0xacb   : > { %v1782_v58 = vmul.f32 1.442695, %v1781_v56 }
 0xacd   : > { %2700 = vpow2.f32 %v1782_v58 }
 0xace   : > { %2702 = vpow2.f32 %v1831_v63 }
 0xad2   : > { %v2699_v59 = vpop.eup %2698 }
 0xad3   : > { %v1833_v60 = vsel %vm878_vm5, %v2699_v59, 0.0 }
 0xad4   : > { %1834 = vadd.xlane.f32.xlu0 %v1833_v60 }
 0xada   : > { %v2701_v57 = vpop.eup %2700 }
 0xadb   : > { %v1784_v61 = vsel %vm788_vm3, %v2701_v57, 0.0  ;;  %v2703_v1 = vpop.eup %2702 }
 0xadc   : > { %1785 = vadd.xlane.f32.xlu1 %v1784_v61  ;;  %v1836_v2 = vsel %vm878_vm5, %v2703_v1, 0.0 }
 0xaed   : > { %1891 = vrot.lane.b32.xlu1 %v3265_v32, %s2957_s24 }
 0xb11   : > { %1837 = vadd.xlane.f32.xlu1 %v1836_v2 }
 0xb22   : > { %1844 = vrot.lane.b32.xlu1 %v3271_v45, %s2957_s24  ;;  %s2842_s24 = scalar_lea.vmem %s3442_s28, 128 }
 0xb23   : > { %p2843_p7 = scmp.ne.s32.totalorder %s3442_s28, %s2842_s24  ;;  %p2850_p9 = scmp.lt.s32.totalorder %s2848_s22, %s2842_s24 }
 0xb25   : > { %p2844_p0 = pnand %p2843_p7, %p3563_p10  ;;  %p2851_p11 = por %p2850_p9, %p2849_p2 }
 0xb27   : > { %p2845_p12 = pneg %p2844_p0 }
 0xb29   : > { %p2852_p13 = pnand %p2851_p11, %p2845_p12 }
 0xb5d   : > { %v1835_v6 = vpop.xlane.xlu0 %1834 }
 0xb65   : > { %v1786_v3 = vpop.xlane.xlu1 %1785 }
 0xb66   : > { %2704 = vrcp.f32 %v1786_v3 }
 0xb67   : > { %2706 = vrcp.f32 %v1835_v6 }
 0xb69   : > { %v1892_v4 = vpop.permute.xlu1 %1891 }
 0xb6a   : > { %v1897_v5 = vsel %vm949_vm4, %v1892_v4, 0 }
 0xb6b   : > { %2523 = vmatpush3.bf16.msra.mxu1 %v1897_v5 }
 0xb6c   : > { %2534 = vmatprep.subr.bf16.mxu1 %v2953_v0 }
 0xb73   : > { %v2705_v32 = vpop.eup %2704 }
 0xb74   : > { %v1788_v8 = vmul.f32 %v2705_v32, %v2701_v57  ;;  %v2707_v45 = vpop.eup %2706 }
 0xb75   : > { %v1841_v12 = vmul.f32 %v2707_v45, %v2699_v59 }
 0xb76   : > { %v1843_v10 = vpack.c.bf16 %v1788_v8, %v1788_v8 }
 0xb9a   : > { %v1838_v7 = vpop.xlane.xlu1 %1837 }
 0xb9b   : > { %2708 = vrcp.f32 %v1838_v7 }
 0xb9e   : > { %v1845_v9 = vpop.permute.xlu1 %1844 }
 0xb9f   : > { %2517 = vmatpush3.bf16.msra.mxu0 %v1845_v9 }
 0xba0   : > { %2528 = vmatprep.subr.bf16.mxu0 %v2953_v0 }
 0xba2   : > { %2519 = vmatmul.mubr.msk.bf16.vlgmr.msra.gmra.mxu0 %vm788_vm3, %v1843_v10 }
 0xba3   : > { %2530 = vmatprep.mubr.msk.bf16.mxu0 %vm2954_vm0, %v2953_v0  ;;  %2529 = vmatpush3.bf16.msra.mxu0 %v2660_v15 }
 0xba8   : > { %v2709_v11 = vpop.eup %2708 }
 0xba9   : > { %v1842_v13 = vmul.f32 %v2709_v11, %v2703_v1 }
 0xbab   : > { %v1890_v14 = vpack.c.bf16 %v1842_v13, %v1841_v12 }
 0xbad   : > { %2525 = vmatmul.mubr.msk.bf16.vlgmr.msra.gmra.mxu1 %vm878_vm5, %v1890_v14 }
 0xbae   : > { %2536 = vmatprep.mubr.msk.bf16.mxu1 %vm2954_vm0, %v2953_v0  ;;  %2535 = vmatpush3.bf16.msra.mxu1 %v2661_v18 }
 0xc62   : > { %v1884_v20 = vpop.f32.mrf.mxu0 }
 0xc63   : > { %v1940_v21 = vpack.c.bf16 %v1884_v20, %v1884_v20 }
 0xc64   : > { %v2520_v22 = vpop.f32.mrf.mxu0 }
 0xc65   : > { %2531 = vmatmul.mubr.msk.bf16.vlgmr.msra.gmra.mxu0 %vm788_vm3, %v1940_v21 }
 0xc66   : > { %v1887_v23 = vpop.f32.mrf.mxu0 }
 0xc68   : > { %v2521_v24 = vpop.f32.mrf.mxu0 }
 0xc6d   : > { %v1933_v25 = vpop.f32.mrf.mxu1 }
 0xc6f   : > { %v2526_v26 = vpop.f32.mrf.mxu1 }
 0xc71   : > { %v1936_v27 = vpop.f32.mrf.mxu1 }
 0xc72   : > { %v1990_v0 = vpack.c.bf16 %v1936_v27, %v1933_v25 }
 0xc73   : > { %v2527_v29 = vpop.f32.mrf.mxu1 }
 0xc74   : > { %2537 = vmatmul.mubr.msk.bf16.vlgmr.msra.gmra.mxu1 %vm788_vm3, %v1990_v0 }
 0xd25   : > { %v1984_v31 = vpop.f32.mrf.mxu0 }
 0xd26   : > { %v2041_v33 = vadd.f32 %v1984_v31, %v3396_v28 }
 0xd27   : > { %v2532_v34 = vpop.f32.mrf.mxu0 }
 0xd28   : > { %v2050_v35 = vadd.f32 %v2313_v30, %v2041_v33 }
 0xd29   : > { %v1987_v36 = vpop.f32.mrf.mxu0 }
 0xd2a   : > { %2051 = vst.msk [vmem:[%s478_s16] sm:$0xff] %vm549_vm1, %v2050_v35 }
 0xd2b   : > { %v2533_v37 = vpop.f32.mrf.mxu0 }
 0xd2c   : > { %2855 = shalt.err (!%p2852_p13)
}
 0xd2d   : > { %s2856_s15 = scalar_lea.hbm %s3440_s5, 128  ;;  %s2860_s13 = scalar_lea.hbm %s3533_s10, 256 }
 0xd2e   : > { %p2857_p1 = scmp.ne.s32.totalorder %s3440_s5, %s2856_s15  ;;  %p2861_p6 = scmp.lt.s32.totalorder %s3440_s5, %s3533_s10 }
 0xd2f   : > { %p2862_p5 = scmp.lt.s32.totalorder %s2860_s13, %s2856_s15 }
 0xd30   : > { %p2858_p3 = pnand %p2857_p1, %p3563_p10 }
 0xd31   : > { %p2863_p8 = por %p2862_p5, %p2861_p6 }
 0xd32   : > { %p2859_p4 = pneg %p2858_p3 }
 0xd34   : > { %p2864_p7 = pnand %p2863_p8, %p2859_p4 }
 0xd36   : > { %2867 = shalt.err (!%p2864_p7)
}
 0xd37   : > { %2558 = dma.vmem_to_hbm [thread:$0]  (%p3563_p10), %s3442_s28, 128, %s3440_s5, %s2063_s19   ;;  %v2314_v28 = vld [vmem:[%s3532_s9] ss:$0 sm:$0xff]  ;;  %v2034_v19 = vpop.f32.mrf.mxu1 }
 0xd38   : > { %s2265_s2 = sshll.u32 %s3186_s8, 4  ;;  %v2042_v38 = vadd.f32 %v2034_v19, %v3405_v43  ;;  %s2323_s12 = sshll.u32 %s3043_s23, 8 }
 0xd39   : > { %v2538_v39 = vpop.f32.mrf.mxu1  ;;  %s485_s25 = scalar_lea.vmem [#allocation12], %s2265_s2  ;;  %s3477_s19 = scalar_lea.hbm %s3534_s11, %s2323_s12 }
 0xd3a   : > { %v2058_v41 = vadd.f32 %v2314_v28, %v2042_v38  ;;  %s2094_s22 = sshll.u32 %s485_s25, 4  ;;  %s2068_s23 = scalar_lea.sflag [#allocation13], %s3186_s8  ;;  %s3479_s22 = int_to_ptr.vmem [resolvable:$true] %s2094_s22 }
 0xd3b   : > { %v2037_v17 = vpop.f32.mrf.mxu1  ;;  %s2868_s15 = scalar_lea.vmem %s3479_s22, 256  ;;  %s2959_s27 = smov [#allocation12]  }
 0xd3c   : > { %2060 = vst.msk [vmem:[%s485_s25] sm:$0xff] %vm676_vm2, %v2058_v41  ;;  %v2043_v44 = vadd.f32 %v2037_v17, %v3408_v50  ;;  %p2869_p0 = scmp.ne.s32.totalorder %s3479_s22, %s2868_s15  ;;  %s2872_s26 = sshll.u32 %s2959_s27, 4  ;;  %s2873_s26 = int_to_ptr.vmem [resolvable:$false] %s2872_s26 }
 0xd3d   : > { %v2539_v46 = vpop.f32.mrf.mxu1  ;;  %s2874_s13 = scalar_lea.vmem %s2873_s26, 512  ;;  %p2875_p9 = scmp.lt.s32.totalorder %s3479_s22, %s2873_s26 }
 0xd3e   : > { %v2059_v47 = vadd.f32 %v2314_v28, %v2043_v44  ;;  %p2870_p12 = pnand %p2869_p0, %p3563_p10  ;;  %p2876_p11 = scmp.lt.s32.totalorder %s2874_s13, %s2868_s15 }
 0xd40   : > { %2061 = vst.msk [vmem:[%s485_s25 + $0x8] sm:$0xff] %vm676_vm2, %v2059_v47  ;;  %p2871_p2 = pneg %p2870_p12  ;;  %p2877_p13 = por %p2876_p11, %p2875_p9 }
 0xd42   : > { %p2878_p1 = pnand %p2877_p13, %p2871_p2 }
 0xd44   : > { %2881 = shalt.err (!%p2878_p1)
}
 0xd45   : > { %s2882_s29 = scalar_lea.hbm %s3477_s19, 256  ;;  %s2886_s3 = scalar_lea.hbm %s3534_s11, 512 }
 0xd46   : > { %p2883_p3 = scmp.ne.s32.totalorder %s3477_s19, %s2882_s29  ;;  %p2887_p5 = scmp.lt.s32.totalorder %s3477_s19, %s3534_s11 }
 0xd47   : > { %p2888_p8 = scmp.lt.s32.totalorder %s2886_s3, %s2882_s29 }
 0xd48   : > { %p2884_p4 = pnand %p2883_p3, %p3563_p10 }
 0xd49   : > { %p2889_p7 = por %p2888_p8, %p2887_p5 }
 0xd4a   : > { %p2885_p6 = pneg %p2884_p4 }
 0xd4c   : > { %p2890_p0 = pnand %p2889_p7, %p2885_p6 }
 0xd4e   : > { %2893 = shalt.err (!%p2890_p0)
}
 0xd4f   : > { %s2960_s25 = smov 128   ;;  %s2961_s28 = smov 8  }
 0xd50   : > { %2559 = dma.vmem_to_hbm [thread:$0]  (%p3563_p10), %s3479_s22, 256, %s3477_s19, %s2068_s23, %s2960_s25, %s2960_s25, %s2961_s28  }
 0xd51 PF: > { %s2109_s5 = sand.u32 1, %s2932_s17   ;;  %p3564_p12 = scmp.ne.s32.totalorder %s3555_s14, 0 }
 0xd52   : > { %p3565_p2 = scmp.ge.s32.totalorder %s2944_s20, 2  ;;  %s2110_s15 = scalar_lea.sflag [#allocation4], %s2109_s5 }
 0xd54   : > { %p2580_p9 = pnand %p3565_p2, %p3564_p12 }
 0xd56   : > { %p2581_p11 = pneg %p2580_p9 }
 0xd58   : > { %2923 = dma.done.wait (%p2581_p11), %s2110_s15, 128  }
 0xd59   : > { %2925 = vsyncadd (%p2581_p11), %s2110_s15, 4294967168  ;;  %s2119_s27 = scalar_lea.sflag [#allocation13], %s2109_s5 }
 0xd5a   : > { %2927 = dma.done.wait (%p2581_p11), %s2119_s27, 256  }
 0xd5b   : > { %2929 = vsyncadd (%p2581_p11), %s2119_s27, 4294967040  ;;  %s3566_s30 = sld [smem:[#allocation19_spill]]  ;;  %p30_p10 = scmp.ge.s32.totalorder %s3123_s21, 4  }
 0xd5c   : > { %s3567_s19 = sld [smem:[#allocation20_spill]]  ;;  %s3568_s17 = smov %s2936_s18 }
 0xd5d   : > { %s3570_s20 = smov %s3123_s21  ;;  %32 = sbr.rel (!%p30_p10) target bundleno = 14 (0xe), region = 141 }
 0xd61   : > { %s3569_s18 = smov %s3566_s30 }
 0xd62   :  { %2124 = vsyncpa [#allocation3], 1 }
 0xd63   :  { %2126 = vsyncpa [#allocation3 + $0x1], 1 }
 0xd64   :  { %2127 = vsyncpa [#allocation6], 1 }
 0xd65   :  { %2128 = vsyncpa [#allocation9], 1 }
 0xd66   :  { %2129 = vsyncpa [#allocation4], 1 }
 0xd67   :  { %2131 = vsyncpa [#allocation4 + $0x1], 1 }
 0xd68   :  { %2132 = vsyncpa [#allocation13], 1 }
 0xd69   :  { %2134 = vsyncpa [#allocation13 + $0x1], 1 }

</bundles_post_ra>
